<compile_context>
chip_gen: v6e
topology: v6e:2x2x1
jax: 0.10.0
libtpu: 0.0.40
codegen_flags: <defaults>
</compile_context>

<pallas_src>
import functools

import jax
import jax.numpy as jnp
from jax import lax
from jax.experimental import pallas as pl
from jax.experimental.pallas import tpu as pltpu

LANE = 128
MAX_TILE_ROWS = 512        # 512 * 128 = 65536 anchors / grid step (~3.9 MiB inputs)
CHUNK_ROWS = 16            # strip-mine chunk inside the kernel body


# ----------------------------- in-kernel helpers ----------------------------

def _exact_floor_div(n, d):
    """Exact floor(n / d) for integer-valued f32 n.
    TODO(synk): only exact for N = D*H*W < 2**24 (f32 integer range)."""
    q = jnp.floor(n * (1.0 / d))
    q = jnp.where(q * d > n, q - 1.0, q)
    q = jnp.where((q + 1.0) * d <= n, q + 1.0, q)
    return q


def _anchor_coords(n0, rows, dims):
    """Anchor (z, y, x) and linear index for `rows` consecutive 128-lane rows
    starting at linear anchor index n0 (z-major flattening, matches
    cartesian_prod(sz, sy, sx))."""
    _, h, w = dims
    row = lax.broadcasted_iota(jnp.int32, (rows, LANE), 0).astype(jnp.float32)
    lane = lax.broadcasted_iota(jnp.int32, (rows, LANE), 1).astype(jnp.float32)
    n = jnp.asarray(n0).astype(jnp.float32) + row * float(LANE) + lane
    hw = float(h * w)
    z = _exact_floor_div(n, hw)
    rem = n - z * hw
    y = _exact_floor_div(rem, float(w))
    x = rem - y * float(w)
    return z, y, x, n


# ------------------------------ Pallas kernels -------------------------------

def _fused_loss_kernel(has_pos_ref,                      # SMEM scalar prefetch (B,)
                       pred_ref, tgt_ref, mig_ref,       # (1, TR, 128)
                       poff_ref, pshp_ref, tbox_ref,     # (1, 3/3/6, TR, 128)
                       cls_ref, sums_ref, *,             # outputs
                       alpha, gamma, fn_weight, fn_threshold,
                       strides, dims, tile_rows, chunk_rows, tiles_per_p,
                       n_real, eps):
    b = pl.program_id(0)
    p = pl.program_id(1)
    t = pl.program_id(2)
    tile_idx = p * tiles_per_p + t
    tile_base = tile_idx * (tile_rows * LANE)
    has_pos = has_pos_ref[b] > 0
    inv_strides = tuple(1.0 / s for s in strides)

    @pl.when(t == 0)
    def _init():
        sums_ref[...] = jnp.zeros_like(sums_ref)

    def process_chunk(r0, rows, accs):
        reg_acc, off_acc, diou_acc, pos_acc = accs
        pred = pred_ref[0, pl.ds(r0, rows), :].astype(jnp.float32)
        tgt = tgt_ref[0, pl.ds(r0, rows), :]
        mig = mig_ref[0, pl.ds(r0, rows), :]

        anc_z, anc_y, anc_x, n_lin = _anchor_coords(
            tile_base + r0 * LANE, rows, dims)
        anc = (anc_z, anc_y, anc_x)
        valid = n_lin < float(n_real)

        # ---- classification: weighted focal BCE (exact sigmoid) ----
        exp_neg_abs = jnp.exp(-jnp.abs(pred))
        inv = 1.0 / (1.0 + exp_neg_abs)
        prob = jnp.where(pred >= 0.0, inv, exp_neg_abs * inv)        # sigmoid(pred)
        prob = jnp.clip(prob, 1e-4, 1.0 - 1e-4)

        is_pos = tgt == 1.0
        alpha_factor = jnp.where(is_pos, alpha, 1.0 - alpha)
        focal = jnp.where(is_pos, 1.0 - prob, prob)
        if gamma == 2.0:
            focal = focal * focal
        else:
            focal = jnp.exp(gamma * jnp.log(focal))
        bce = jnp.maximum(pred, 0.0) - pred * tgt + jnp.log(1.0 + exp_neg_abs)
        loss = alpha_factor * focal * bce
        loss = jnp.where(jnp.logical_and(mig == 0.0, valid), loss, 0.0)
        fn_idx = jnp.logical_and(prob < fn_threshold, is_pos)
        loss = jnp.where(jnp.logical_and(has_pos, fn_idx), loss * fn_weight, loss)
        # TODO(synk): the reference hard-FP branch compares sigmoid probs against
        # 1.5 and can never fire; reproduced as the same no-op (omitted).
        cls_ref[0, pl.ds(r0, rows), :] = loss

        # ---- regression / offset / DIoU, masked partial sums per chunk ----
        reg_l1 = off_l1 = inter = vol1 = vol2 = c2 = rho2 = None
        for c in range(3):
            s = strides[c]
            p_off = poff_ref[0, c, pl.ds(r0, rows), :].astype(jnp.float32)
            p_shp = pshp_ref[0, c, pl.ds(r0, rows), :].astype(jnp.float32)
            t_ctr = tbox_ref[0, c, pl.ds(r0, rows), :]
            t_dhw = tbox_ref[0, 3 + c, pl.ds(r0, rows), :]

            # target_shape / target_offset are exact functions of target_bboxes.
            d_reg = jnp.abs(p_shp - t_dhw * 0.5)
            d_off = jnp.abs(p_off - (t_ctr * inv_strides[c] - anc[c]))
            reg_l1 = d_reg if reg_l1 is None else reg_l1 + d_reg
            off_l1 = d_off if off_l1 is None else off_l1 + d_off

            # decoded boxes (input space): half extent of pred box == p_shp
            p_ctr = (anc[c] + p_off) * s
            b1_lo = p_ctr - p_shp
            b1_hi = p_ctr + p_shp
            b2_lo = t_ctr - t_dhw * 0.5
            b2_hi = t_ctr + t_dhw * 0.5

            ov = jnp.maximum(jnp.minimum(b1_hi, b2_hi) - jnp.maximum(b1_lo, b2_lo), 0.0)
            e1 = b1_hi - b1_lo
            e2 = b2_hi - b2_lo
            ce = jnp.maximum(b1_hi, b2_hi) - jnp.minimum(b1_lo, b2_lo)
            rr = b2_lo + b2_hi - b1_lo - b1_hi

            inter = ov if inter is None else inter * ov
            vol1 = e1 if vol1 is None else vol1 * e1
            vol2 = e2 if vol2 is None else vol2 * e2
            c2 = ce * ce if c2 is None else c2 + ce * ce
            rho2 = rr * rr if rho2 is None else rho2 + rr * rr

        inter = inter + eps
        union = vol1 + vol2 - inter
        iou = inter * pl.reciprocal(union, approx=True)
        diou = iou - rho2 * 0.25 * pl.reciprocal(c2 + eps, approx=True)

        is_pos_v = jnp.logical_and(is_pos, valid)
        reg_acc = reg_acc + jnp.sum(jnp.where(is_pos_v, reg_l1, 0.0), axis=0, keepdims=True)
        off_acc = off_acc + jnp.sum(jnp.where(is_pos_v, off_l1, 0.0), axis=0, keepdims=True)
        diou_acc = diou_acc + jnp.sum(jnp.where(is_pos_v, diou, 0.0), axis=0, keepdims=True)
        pos_acc = pos_acc + jnp.sum(jnp.where(is_pos_v, loss, 0.0), axis=0, keepdims=True)
        return reg_acc, off_acc, diou_acc, pos_acc

    zero = jnp.zeros((1, LANE), jnp.float32)
    accs = (zero, zero, zero, zero)
    n_full = tile_rows // chunk_rows
    rem = tile_rows - n_full * chunk_rows
    if n_full == 1 and rem == 0:
        accs = process_chunk(0, chunk_rows, accs)
    else:
        def body(i, carry):
            r0 = pl.multiple_of(i * chunk_rows, chunk_rows)
            return process_chunk(r0, chunk_rows, carry)
        accs = lax.fori_loop(0, n_full, body, accs)
        if rem > 0:
            accs = process_chunk(n_full * chunk_rows, rem, accs)

    reg_acc, off_acc, diou_acc, pos_acc = accs
    sums_ref[0, 0, 0:1, :] += reg_acc
    sums_ref[0, 0, 1:2, :] += off_acc
    sums_ref[0, 0, 2:3, :] += diou_acc
    sums_ref[0, 0, 3:4, :] += pos_acc


def _distance_kernel(ctr_sp_ref, out_ref, *, dims, tile_rows, chunk_rows,
                     n_real, num_annots):
    """distance[a, n] = -sum_c ((ctr[a,c] - anchor[n,c]) * sp[a,c])^2 for one
    (batch, anchor-tile).  ctr/sp live in SMEM as a flat (B, A*6) table."""
    b = pl.program_id(0)
    t = pl.program_id(1)
    tile_base = t * (tile_rows * LANE)

    # hoist scalar reads out of the chunk loop (loop-invariant).
    ann_params = []
    for a in range(num_annots):
        ctrs = tuple(ctr_sp_ref[b, a * 6 + c] for c in range(3))
        sps = tuple(ctr_sp_ref[b, a * 6 + 3 + c] for c in range(3))
        ann_params.append((ctrs, sps))

    def process_chunk(r0, rows):
        anc_z, anc_y, anc_x, n_lin = _anchor_coords(tile_base + r0 * LANE, rows, dims)
        anc = (anc_z, anc_y, anc_x)
        in_range = n_lin < float(n_real)
        for a in range(num_annots):
            ctrs, sps = ann_params[a]
            acc = None
            for c in range(3):
                d = (ctrs[c] - anc[c]) * sps[c]
                acc = d * d if acc is None else acc + d * d
            out_ref[0, a, pl.ds(r0, rows), :] = jnp.where(in_range, -acc, -1e30)

    n_full = tile_rows // chunk_rows
    rem = tile_rows - n_full * chunk_rows
    if n_full == 1 and rem == 0:
        process_chunk(0, chunk_rows)
    else:
        def body(i, carry):
            process_chunk(pl.multiple_of(i * chunk_rows, chunk_rows), chunk_rows)
            return carry
        lax.fori_loop(0, n_full, body, jnp.int32(0))
        if rem > 0:
            process_chunk(n_full * chunk_rows, rem)


# --------------------------------- Module glue -------------------------------

class DetectionLossPallas:
    def __init__(self, crop_size=(64, 128, 128), pos_target_topk=7, pos_ignore_ratio=3,
                 cls_num_neg=10000, cls_num_hard=100, cls_fn_weight=4.0,
                 cls_fn_threshold=0.8, cls_neg_pos_ratio=100,
                 cls_hard_fp_weight=2.0, cls_hard_fp_threshold=0.7):
        self.crop_size = tuple(float(c) for c in crop_size)
        self.pos_target_topk = pos_target_topk
        self.pos_ignore_ratio = pos_ignore_ratio
        self.cls_num_neg = cls_num_neg
        self.cls_num_hard = cls_num_hard
        self.cls_fn_weight = cls_fn_weight
        self.cls_fn_threshold = cls_fn_threshold
        self.cls_neg_pos_ratio = cls_neg_pos_ratio
        self.cls_hard_fp_weight = cls_hard_fp_weight
        self.cls_hard_fp_threshold = cls_hard_fp_threshold

    # --- target_proprocess (tiny per-annotation logic, vectorized plain JAX) ---
    def _target_preprocess(self, annotations, feat_shape):
        B, A, _ = annotations.shape
        in_z, in_y, in_x = self.crop_size
        D, H, W = feat_shape
        cz, cy, cx = annotations[..., 0], annotations[..., 1], annotations[..., 2]
        dd, hh, ww = annotations[..., 3], annotations[..., 4], annotations[..., 5]
        sp = annotations[..., 6:9]
        valid = annotations[..., -1] > -1

        z1 = jnp.maximum(cz - dd / 2.0, 0.0)
        y1 = jnp.maximum(cy - hh / 2.0, 0.0)
        x1 = jnp.maximum(cx - ww / 2.0, 0.0)
        z2 = jnp.minimum(cz + dd / 2.0, in_z)
        y2 = jnp.minimum(cy + hh / 2.0, in_y)
        x2 = jnp.minimum(cx + ww / 2.0, in_x)
        nd = jnp.maximum(z2 - z1, 0.0)
        nh = jnp.maximum(y2 - y1, 0.0)
        nw = jnp.maximum(x2 - x1, 0.0)
        vol = nd * nh * nw
        percent = vol / (dd * hh * ww)
        keep_inner = (percent > 0.1) & (vol >= 15.0)
        keep = valid & (vol != 0.0) & keep_inner
        ignore = valid & (vol != 0.0) & jnp.logical_not(keep_inner)

        new_ann = jnp.stack(
            [z1 + 0.5 * nd, y1 + 0.5 * nh, x1 + 0.5 * nw, nd, nh, nw,
             sp[..., 0], sp[..., 1], sp[..., 2], jnp.zeros_like(nd)], axis=-1)
        ann_new = jnp.where(keep[..., None], new_ann, -jnp.ones_like(new_ann))

        # dense ignore mask at FEATURE resolution, indexed with input-space
        # coordinates (reproduces the reference's clamped slicing).
        iz = jnp.arange(D, dtype=jnp.float32)
        iy = jnp.arange(H, dtype=jnp.float32)
        ix = jnp.arange(W, dtype=jnp.float32)
        mz = (iz[None, None, :] >= jnp.floor(z1)[..., None]) & \
             (iz[None, None, :] < jnp.ceil(z2)[..., None])
        my = (iy[None, None, :] >= jnp.floor(y1)[..., None]) & \
             (iy[None, None, :] < jnp.ceil(y2)[..., None])
        mx = (ix[None, None, :] >= jnp.floor(x1)[..., None]) & \
             (ix[None, None, :] < jnp.ceil(x2)[..., None])
        region = (ignore[..., None, None, None]
                  & mz[:, :, :, None, None]
                  & my[:, :, None, :, None]
                  & mx[:, :, None, None, :])
        mask_ignore = jnp.where(jnp.any(region, axis=1), -1.0, 0.0)   # (B,D,H,W)
        return ann_new, mask_ignore.reshape(B, D * H * W)

    # --- get_pos_target (distance map in Pallas, top-k assignment in JAX) ---
    def _get_pos_target(self, annotations, strides, dims, r_real, tile_rows,
                        chunk_rows, n_real):
        B, A, _ = annotations.shape
        topk = self.pos_target_topk
        k_all = (self.pos_ignore_ratio + 1) * topk
        n_flat = r_real * LANE
        stride_arr = jnp.asarray(strides, jnp.float32)
        mask_gt = (annotations[..., -1] > -1).astype(jnp.float32)      # (B,A)
        ctr_gt = annotations[..., :3] / stride_arr                     # (B,A,3)
        sp = annotations[..., 6:9]                                     # (B,A,3)
        ctr_sp = jnp.concatenate([ctr_gt, sp], axis=-1).reshape(B, A * 6)

        num_tiles = -(-r_real // tile_rows)
        dist = pl.pallas_call(
            functools.partial(_distance_kernel, dims=dims, tile_rows=tile_rows,
                              chunk_rows=chunk_rows, n_real=n_real, num_annots=A),
            out_shape=jax.ShapeDtypeStruct((B, A, r_real, LANE), jnp.float32),
            grid=(B, num_tiles),
            in_specs=[pl.BlockSpec(memory_space=pltpu.MemorySpace.SMEM)],
            out_specs=pl.BlockSpec((1, A, tile_rows, LANE),
                                   lambda b, t: (b, 0, t, 0)),
            compiler_params=pltpu.CompilerParams(
                dimension_semantics=("parallel", "parallel")),
        )(ctr_sp)
        distance = dist.reshape(B, A, n_flat)

        # TODO(synk): anchor assignment needs a (small-k) sort; kept in XLA.  For
        # very large N a per-tile partial top-k fused into _distance_kernel would
        # also avoid the (B, A, N) HBM round-trip.
        _, topk_inds = lax.top_k(distance, k_all)                      # (B,A,k_all)
        bi = jnp.arange(B, dtype=jnp.int32)[:, None, None]
        ai = jnp.arange(A, dtype=jnp.int32)[None, :, None]
        zeros = jnp.zeros((B, A, n_flat), jnp.float32)
        mask_topk = zeros.at[bi, ai, topk_inds[:, :, :topk]].add(1.0)
        mask_ign = zeros.at[bi, ai, topk_inds[:, :, topk:]].add(-1.0)
        mask_pos = mask_topk * mask_gt[:, :, None]
        mask_ign = mask_ign * mask_gt[:, :, None]

        gt_idx = jnp.argmax(mask_pos, axis=1)                          # (B, n_flat)
        target_scores = jnp.max(mask_pos, axis=1)                      # (B, n_flat)
        mask_ignore = jnp.min(mask_ign, axis=1)                        # (B, n_flat)

        # channel-major target boxes: tbox[b, c, n] = annotations[b, gt_idx[b,n], c]
        ann6_t = jnp.swapaxes(annotations[..., :6], 1, 2)              # (B, 6, A)
        gt_b = jnp.broadcast_to(gt_idx[:, None, :], (B, 6, n_flat))
        tbox = jnp.take_along_axis(ann6_t, gt_b, axis=2)               # (B, 6, n_flat)
        return tbox, target_scores, mask_ignore

    def __call__(self, output, annotations):
        Cls = output['Cls']          # (B,1,D,H,W)
        Shape = output['Shape']      # (B,3,D,H,W)
        Offset = output['Offset']    # (B,3,D,H,W)
        B = Cls.shape[0]
        D, H, W = Cls.shape[2], Cls.shape[3], Cls.shape[4]
        N = D * H * W
        A = annotations.shape[1]

        r_real = -(-N // LANE)
        n_flat = r_real * LANE
        tile_rows = min(r_real, MAX_TILE_ROWS)
        chunk_rows = min(CHUNK_ROWS, tile_rows)
        num_tiles = -(-r_real // tile_rows)
        # keep both v7x TensorCores busy when the batch is odd / tiny.
        if B % 2 == 1 and num_tiles % 2 == 0 and num_tiles >= 2:
            P = 2
        else:
            P = 1
        tiles_per_p = num_tiles // P
        strides = (self.crop_size[0] / D, self.crop_size[1] / H, self.crop_size[2] / W)

        def to_lanes(x, c):
            x = x.reshape(B, c, N)
            if not jnp.issubdtype(x.dtype, jnp.floating):
                x = x.astype(jnp.float32)
            if n_flat != N:
                # TODO(synk): one small pad copy only when D*H*W % 128 != 0.
                x = jnp.pad(x, ((0, 0), (0, 0), (0, n_flat - N)))
            return x.reshape(B, c, r_real, LANE)

        pred_logit = to_lanes(Cls, 1)[:, 0]                            # (B,r_real,128)
        pred_shp = to_lanes(Shape, 3)                                  # (B,3,r_real,128)
        pred_off = to_lanes(Offset, 3)

        ann = annotations.astype(jnp.float32)
        ann_new, tmi = self._target_preprocess(ann, (D, H, W))         # tmi (B,N)
        tbox_cm, target_scores, mask_ignore_pos = self._get_pos_target(
            ann_new, strides, (D, H, W), r_real, tile_rows, chunk_rows, N)

        if n_flat != N:
            tmi = jnp.pad(tmi, ((0, 0), (0, n_flat - N)))
        mig = ((mask_ignore_pos != 0.0) | (tmi != 0.0)).astype(jnp.float32)   # (B,n_flat)

        num_pos = jnp.sum(target_scores == 1.0, axis=1).astype(jnp.int32)     # (B,)
        has_pos = (num_pos > 0).astype(jnp.int32)

        tbox_l = tbox_cm.reshape(B, 6, r_real, LANE)
        tgt_l = target_scores.reshape(B, r_real, LANE)
        mig_l = mig.reshape(B, r_real, LANE)

        # -------- fused cls / reg / offset / DIoU kernel (single pallas_call) --------
        kernel = functools.partial(
            _fused_loss_kernel, alpha=0.75, gamma=2.0,
            fn_weight=self.cls_fn_weight, fn_threshold=self.cls_fn_threshold,
            strides=strides, dims=(D, H, W), tile_rows=tile_rows,
            chunk_rows=chunk_rows, tiles_per_p=tiles_per_p, n_real=N, eps=1e-7)

        cls_map, sums = pl.pallas_call(
            kernel,
            out_shape=(jax.ShapeDtypeStruct((B, r_real, LANE), jnp.float32),
                       jax.ShapeDtypeStruct((B, P, 4, LANE), jnp.float32)),
            grid_spec=pltpu.PrefetchScalarGridSpec(
                num_scalar_prefetch=1,
                grid=(B, P, tiles_per_p),
                in_specs=[
                    pl.BlockSpec((1, tile_rows, LANE),
                                 lambda b, p, t, *_: (b, p * tiles_per_p + t, 0)),
                    pl.BlockSpec((1, tile_rows, LANE),
                                 lambda b, p, t, *_: (b, p * tiles_per_p + t, 0)),
                    pl.BlockSpec((1, tile_rows, LANE),
                                 lambda b, p, t, *_: (b, p * tiles_per_p + t, 0)),
                    pl.BlockSpec((1, 3, tile_rows, LANE),
                                 lambda b, p, t, *_: (b, 0, p * tiles_per_p + t, 0)),
                    pl.BlockSpec((1, 3, tile_rows, LANE),
                                 lambda b, p, t, *_: (b, 0, p * tiles_per_p + t, 0)),
                    pl.BlockSpec((1, 6, tile_rows, LANE),
                                 lambda b, p, t, *_: (b, 0, p * tiles_per_p + t, 0)),
                ],
                out_specs=(
                    pl.BlockSpec((1, tile_rows, LANE),
                                 lambda b, p, t, *_: (b, p * tiles_per_p + t, 0)),
                    pl.BlockSpec((1, 1, 4, LANE),
                                 lambda b, p, t, *_: (b, p, 0, 0)),
                ),
            ),
            compiler_params=pltpu.CompilerParams(
                dimension_semantics=("parallel", "parallel", "arbitrary")),
        )(has_pos, pred_logit, tgt_l, mig_l, pred_off, pred_shp, tbox_l)

        sums = jnp.sum(sums, axis=1)                                   # (B,4,128)

        # ----------------------- classification loss assembly -----------------------
        loss_map = cls_map.reshape(B, n_flat)
        pos_sum = jnp.sum(sums[:, 3, :], axis=-1)                      # (B,)
        denom = jnp.maximum(num_pos.astype(jnp.float32), 1.0)
        pos_contrib = jnp.where(num_pos > 0, pos_sum / denom, 0.0)

        # hard negative mining (statically capped k).
        # TODO(synk): the reference random-subsamples negatives to cls_num_neg
        # before top-k (stochastic); omitted.  For large N we use approx_max_k.
        valid = jnp.arange(n_flat) < N
        neg_mask = (target_scores == 0.0) & valid[None, :]
        neg_vals = jnp.where(neg_mask, loss_map, -1.0)                 # losses >= 0
        k_cap = int(min(N, max(self.cls_neg_pos_ratio * self.pos_target_topk * A,
                               self.cls_num_hard)))
        k_cap = max(k_cap, 1)
        if N > 32768 and k_cap > 512:
            neg_top, _ = lax.approx_max_k(neg_vals, k_cap)
        else:
            neg_top, _ = lax.top_k(neg_vals, k_cap)                    # (B, k_cap)
        n_neg = (N - num_pos).astype(jnp.int32)
        k_dyn = jnp.where(num_pos > 0,
                          jnp.minimum(self.cls_neg_pos_ratio * num_pos, n_neg),
                          jnp.minimum(self.cls_num_hard, n_neg))
        idx = jnp.arange(k_cap, dtype=jnp.int32)[None, :]
        neg_sum = jnp.sum(jnp.where(idx < k_dyn[:, None], neg_top, 0.0), axis=1)
        neg_contrib = jnp.where(num_pos > 0, neg_sum / denom, neg_sum)

        cls_pos_loss = jnp.sum(pos_contrib) / B
        cls_neg_loss = jnp.sum(neg_contrib) / B

        # ----------------------- regression / offset / DIoU -----------------------
        fg_count = jnp.sum(num_pos).astype(jnp.float32)
        safe = jnp.maximum(fg_count, 1.0)
        reg_sum = jnp.sum(sums[:, 0, :])
        off_sum = jnp.sum(sums[:, 1, :])
        diou_sum = jnp.sum(sums[:, 2, :])
        reg_loss = jnp.where(fg_count > 0, reg_sum / (3.0 * safe), 0.0)
        offset_loss = jnp.where(fg_count > 0, off_sum / (3.0 * safe), 0.0)
        iou_loss = jnp.where(fg_count > 0, 1.0 - diou_sum / safe, 0.0)

        return cls_pos_loss, cls_neg_loss, reg_loss, offset_loss, iou_loss


# ------------------------------------ main ------------------------------------

if __name__ == "__main__":
    key = jax.random.PRNGKey(0)
    B, D, H, W = 2, 4, 8, 8
    crop_size = [16, 32, 32]

    k1, k2, k3 = jax.random.split(key, 3)
    Cls = jax.random.normal(k1, (B, 1, D, H, W), jnp.float32)
    Shape = jax.random.normal(k2, (B, 3, D, H, W), jnp.float32) * 0.5 + 2.0
    Offset = jax.random.normal(k3, (B, 3, D, H, W), jnp.float32) * 0.5

    A = 8  # num_annotations (rows filled with -1 are "ignored" per the spec)
    ann = -jnp.ones((B, A, 10), jnp.float32)
    ann = ann.at[0, 0].set(jnp.array([8., 16., 16., 6., 8., 8., 1., 1., 1., 0.]))
    ann = ann.at[0, 1].set(jnp.array([4., 8., 24., 5., 6., 6., 1., 1., 1., 0.]))
    ann = ann.at[1, 0].set(jnp.array([10., 20., 10., 6., 6., 6., 1., 1., 1., 0.]))
    ann = ann.at[1, 1].set(jnp.array([1., 2., 2., 2., 2., 2., 1., 1., 1., 0.]))    # too small -> ignore region
    ann = ann.at[1, 2].set(jnp.array([15., 30., 30., 8., 8., 8., 1., 1., 1., 0.]))  # clipped, kept

    loss_fn = DetectionLossPallas(crop_size=crop_size)
    output = {'Cls': Cls, 'Shape': Shape, 'Offset': Offset}

    losses = jax.jit(lambda o, a: loss_fn(o, a))(output, ann)
    losses = jax.block_until_ready(losses)

    print("KERNEL_OK")
</pallas_src>

<mosaic_0001>
module attributes {stable_mosaic.version = 11 : i64} {
  func.func private @main(%arg0: i32) attributes {dimension_semantics = [#tpu.dimension_semantics<core_parallel>], iteration_bounds = array<i64: 2>, tpu.core_type = #tpu.core_type<sc_scalar_subcore>, window_params = []} {
    return
  }
}

module attributes {stable_mosaic.version = 11 : i64} {
  func.func private @main(%arg0: i32) attributes {dimension_semantics = [#tpu.dimension_semantics<core_parallel>], iteration_bounds = array<i64: 2>, tpu.core_type = #tpu.core_type<sc_scalar_subcore>, window_params = []} {
    return
  }
}

module attributes {stable_mosaic.version = 11 : i64} {
  func.func @_distance_kernel(%arg0: i32, %arg1: i32, %arg2: memref<2x48xf32, #tpu.memory_space<smem>>, %arg3: memref<1x8x2x128xf32, #tpu.memory_space<vmem>>) attributes {dimension_semantics = [#tpu.dimension_semantics<parallel>, #tpu.dimension_semantics<parallel>], iteration_bounds = array<i64: 2, 1>, scalar_prefetch = 0 : i64, scratch_operands = 0 : i64, tpu.core_type = #tpu.core_type<tc>, window_params = [{transform_indices = @transform_0, window_bounds = array<i64: 2, 48>}, {transform_indices = @transform_1, window_bounds = array<i64: 1, 8, 2, 128>}]} {
    %c256_i32 = arith.constant 256 : i32
    %0 = arith.muli %arg1, %c256_i32 : i32
    %1 = arith.index_cast %arg0 : i32 to index
    %c0 = arith.constant 0 : index
    %2 = memref.load %arg2[%1, %c0] : memref<2x48xf32, #tpu.memory_space<smem>>
    %3 = arith.index_cast %arg0 : i32 to index
    %c1 = arith.constant 1 : index
    %4 = memref.load %arg2[%3, %c1] : memref<2x48xf32, #tpu.memory_space<smem>>
    %5 = arith.index_cast %arg0 : i32 to index
    %c2 = arith.constant 2 : index
    %6 = memref.load %arg2[%5, %c2] : memref<2x48xf32, #tpu.memory_space<smem>>
    %7 = arith.index_cast %arg0 : i32 to index
    %c3 = arith.constant 3 : index
    %8 = memref.load %arg2[%7, %c3] : memref<2x48xf32, #tpu.memory_space<smem>>
    %9 = arith.index_cast %arg0 : i32 to index
    %c4 = arith.constant 4 : index
    %10 = memref.load %arg2[%9, %c4] : memref<2x48xf32, #tpu.memory_space<smem>>
    %11 = arith.index_cast %arg0 : i32 to index
    %c5 = arith.constant 5 : index
    %12 = memref.load %arg2[%11, %c5] : memref<2x48xf32, #tpu.memory_space<smem>>
    %13 = arith.index_cast %arg0 : i32 to index
    %c6 = arith.constant 6 : index
    %14 = memref.load %arg2[%13, %c6] : memref<2x48xf32, #tpu.memory_space<smem>>
    %15 = arith.index_cast %arg0 : i32 to index
    %c7 = arith.constant 7 : index
    %16 = memref.load %arg2[%15, %c7] : memref<2x48xf32, #tpu.memory_space<smem>>
    %17 = arith.index_cast %arg0 : i32 to index
    %c8 = arith.constant 8 : index
    %18 = memref.load %arg2[%17, %c8] : memref<2x48xf32, #tpu.memory_space<smem>>
    %19 = arith.index_cast %arg0 : i32 to index
    %c9 = arith.constant 9 : index
    %20 = memref.load %arg2[%19, %c9] : memref<2x48xf32, #tpu.memory_space<smem>>
    %21 = arith.index_cast %arg0 : i32 to index
    %c10 = arith.constant 10 : index
    %22 = memref.load %arg2[%21, %c10] : memref<2x48xf32, #tpu.memory_space<smem>>
    %23 = arith.index_cast %arg0 : i32 to index
    %c11 = arith.constant 11 : index
    %24 = memref.load %arg2[%23, %c11] : memref<2x48xf32, #tpu.memory_space<smem>>
    %25 = arith.index_cast %arg0 : i32 to index
    %c12 = arith.constant 12 : index
    %26 = memref.load %arg2[%25, %c12] : memref<2x48xf32, #tpu.memory_space<smem>>
    %27 = arith.index_cast %arg0 : i32 to index
    %c13 = arith.constant 13 : index
    %28 = memref.load %arg2[%27, %c13] : memref<2x48xf32, #tpu.memory_space<smem>>
    %29 = arith.index_cast %arg0 : i32 to index
    %c14 = arith.constant 14 : index
    %30 = memref.load %arg2[%29, %c14] : memref<2x48xf32, #tpu.memory_space<smem>>
    %31 = arith.index_cast %arg0 : i32 to index
    %c15 = arith.constant 15 : index
    %32 = memref.load %arg2[%31, %c15] : memref<2x48xf32, #tpu.memory_space<smem>>
    %33 = arith.index_cast %arg0 : i32 to index
    %c16 = arith.constant 16 : index
    %34 = memref.load %arg2[%33, %c16] : memref<2x48xf32, #tpu.memory_space<smem>>
    %35 = arith.index_cast %arg0 : i32 to index
    %c17 = arith.constant 17 : index
    %36 = memref.load %arg2[%35, %c17] : memref<2x48xf32, #tpu.memory_space<smem>>
    %37 = arith.index_cast %arg0 : i32 to index
    %c18 = arith.constant 18 : index
    %38 = memref.load %arg2[%37, %c18] : memref<2x48xf32, #tpu.memory_space<smem>>
    %39 = arith.index_cast %arg0 : i32 to index
    %c19 = arith.constant 19 : index
    %40 = memref.load %arg2[%39, %c19] : memref<2x48xf32, #tpu.memory_space<smem>>
    %41 = arith.index_cast %arg0 : i32 to index
    %c20 = arith.constant 20 : index
    %42 = memref.load %arg2[%41, %c20] : memref<2x48xf32, #tpu.memory_space<smem>>
    %43 = arith.index_cast %arg0 : i32 to index
    %c21 = arith.constant 21 : index
    %44 = memref.load %arg2[%43, %c21] : memref<2x48xf32, #tpu.memory_space<smem>>
    %45 = arith.index_cast %arg0 : i32 to index
    %c22 = arith.constant 22 : index
    %46 = memref.load %arg2[%45, %c22] : memref<2x48xf32, #tpu.memory_space<smem>>
    %47 = arith.index_cast %arg0 : i32 to index
    %c23 = arith.constant 23 : index
    %48 = memref.load %arg2[%47, %c23] : memref<2x48xf32, #tpu.memory_space<smem>>
    %49 = arith.index_cast %arg0 : i32 to index
    %c24 = arith.constant 24 : index
    %50 = memref.load %arg2[%49, %c24] : memref<2x48xf32, #tpu.memory_space<smem>>
    %51 = arith.index_cast %arg0 : i32 to index
    %c25 = arith.constant 25 : index
    %52 = memref.load %arg2[%51, %c25] : memref<2x48xf32, #tpu.memory_space<smem>>
    %53 = arith.index_cast %arg0 : i32 to index
    %c26 = arith.constant 26 : index
    %54 = memref.load %arg2[%53, %c26] : memref<2x48xf32, #tpu.memory_space<smem>>
    %55 = arith.index_cast %arg0 : i32 to index
    %c27 = arith.constant 27 : index
    %56 = memref.load %arg2[%55, %c27] : memref<2x48xf32, #tpu.memory_space<smem>>
    %57 = arith.index_cast %arg0 : i32 to index
    %c28 = arith.constant 28 : index
    %58 = memref.load %arg2[%57, %c28] : memref<2x48xf32, #tpu.memory_space<smem>>
    %59 = arith.index_cast %arg0 : i32 to index
    %c29 = arith.constant 29 : index
    %60 = memref.load %arg2[%59, %c29] : memref<2x48xf32, #tpu.memory_space<smem>>
    %61 = arith.index_cast %arg0 : i32 to index
    %c30 = arith.constant 30 : index
    %62 = memref.load %arg2[%61, %c30] : memref<2x48xf32, #tpu.memory_space<smem>>
    %63 = arith.index_cast %arg0 : i32 to index
    %c31 = arith.constant 31 : index
    %64 = memref.load %arg2[%63, %c31] : memref<2x48xf32, #tpu.memory_space<smem>>
    %65 = arith.index_cast %arg0 : i32 to index
    %c32 = arith.constant 32 : index
    %66 = memref.load %arg2[%65, %c32] : memref<2x48xf32, #tpu.memory_space<smem>>
    %67 = arith.index_cast %arg0 : i32 to index
    %c33 = arith.constant 33 : index
    %68 = memref.load %arg2[%67, %c33] : memref<2x48xf32, #tpu.memory_space<smem>>
    %69 = arith.index_cast %arg0 : i32 to index
    %c34 = arith.constant 34 : index
    %70 = memref.load %arg2[%69, %c34] : memref<2x48xf32, #tpu.memory_space<smem>>
    %71 = arith.index_cast %arg0 : i32 to index
    %c35 = arith.constant 35 : index
    %72 = memref.load %arg2[%71, %c35] : memref<2x48xf32, #tpu.memory_space<smem>>
    %73 = arith.index_cast %arg0 : i32 to index
    %c36 = arith.constant 36 : index
    %74 = memref.load %arg2[%73, %c36] : memref<2x48xf32, #tpu.memory_space<smem>>
    %75 = arith.index_cast %arg0 : i32 to index
    %c37 = arith.constant 37 : index
    %76 = memref.load %arg2[%75, %c37] : memref<2x48xf32, #tpu.memory_space<smem>>
    %77 = arith.index_cast %arg0 : i32 to index
    %c38 = arith.constant 38 : index
    %78 = memref.load %arg2[%77, %c38] : memref<2x48xf32, #tpu.memory_space<smem>>
    %79 = arith.index_cast %arg0 : i32 to index
    %c39 = arith.constant 39 : index
    %80 = memref.load %arg2[%79, %c39] : memref<2x48xf32, #tpu.memory_space<smem>>
    %81 = arith.index_cast %arg0 : i32 to index
    %c40 = arith.constant 40 : index
    %82 = memref.load %arg2[%81, %c40] : memref<2x48xf32, #tpu.memory_space<smem>>
    %83 = arith.index_cast %arg0 : i32 to index
    %c41 = arith.constant 41 : index
    %84 = memref.load %arg2[%83, %c41] : memref<2x48xf32, #tpu.memory_space<smem>>
    %85 = arith.index_cast %arg0 : i32 to index
    %c42 = arith.constant 42 : index
    %86 = memref.load %arg2[%85, %c42] : memref<2x48xf32, #tpu.memory_space<smem>>
    %87 = arith.index_cast %arg0 : i32 to index
    %c43 = arith.constant 43 : index
    %88 = memref.load %arg2[%87, %c43] : memref<2x48xf32, #tpu.memory_space<smem>>
    %89 = arith.index_cast %arg0 : i32 to index
    %c44 = arith.constant 44 : index
    %90 = memref.load %arg2[%89, %c44] : memref<2x48xf32, #tpu.memory_space<smem>>
    %91 = arith.index_cast %arg0 : i32 to index
    %c45 = arith.constant 45 : index
    %92 = memref.load %arg2[%91, %c45] : memref<2x48xf32, #tpu.memory_space<smem>>
    %93 = arith.index_cast %arg0 : i32 to index
    %c46 = arith.constant 46 : index
    %94 = memref.load %arg2[%93, %c46] : memref<2x48xf32, #tpu.memory_space<smem>>
    %95 = arith.index_cast %arg0 : i32 to index
    %c47 = arith.constant 47 : index
    %96 = memref.load %arg2[%95, %c47] : memref<2x48xf32, #tpu.memory_space<smem>>
    %c0_i32 = arith.constant 0 : i32
    %97 = arith.addi %0, %c0_i32 : i32
    %98 = tpu.iota {dimensions = array<i32: 0>} : vector<2x128xi32>
    %99 = arith.sitofp %98 : vector<2x128xi32> to vector<2x128xf32>
    %100 = tpu.iota {dimensions = array<i32: 1>} : vector<2x128xi32>
    %101 = arith.sitofp %100 : vector<2x128xi32> to vector<2x128xf32>
    %102 = arith.sitofp %97 : i32 to f32
    %cst = arith.constant 1.280000e+02 : f32
    %103 = vector.broadcast %cst : f32 to vector<2x128xf32>
    %104 = arith.mulf %99, %103 : vector<2x128xf32>
    %105 = vector.broadcast %102 : f32 to vector<2x128xf32>
    %106 = arith.addf %105, %104 : vector<2x128xf32>
    %107 = arith.addf %106, %101 : vector<2x128xf32>
    %cst_0 = arith.constant 1.562500e-02 : f32
    %108 = vector.broadcast %cst_0 : f32 to vector<2x128xf32>
    %109 = arith.mulf %107, %108 : vector<2x128xf32>
    %110 = math.floor %109 : vector<2x128xf32>
    %cst_1 = arith.constant 6.400000e+01 : f32
    %111 = vector.broadcast %cst_1 : f32 to vector<2x128xf32>
    %112 = arith.mulf %110, %111 : vector<2x128xf32>
    %113 = arith.cmpf ogt, %112, %107 : vector<2x128xf32>
    %cst_2 = arith.constant 1.000000e+00 : f32
    %114 = vector.broadcast %cst_2 : f32 to vector<2x128xf32>
    %115 = arith.subf %110, %114 : vector<2x128xf32>
    %116 = arith.select %113, %115, %110 : vector<2x128xi1>, vector<2x128xf32>
    %cst_3 = arith.constant 1.000000e+00 : f32
    %117 = vector.broadcast %cst_3 : f32 to vector<2x128xf32>
    %118 = arith.addf %116, %117 : vector<2x128xf32>
    %cst_4 = arith.constant 6.400000e+01 : f32
    %119 = vector.broadcast %cst_4 : f32 to vector<2x128xf32>
    %120 = arith.mulf %118, %119 : vector<2x128xf32>
    %121 = arith.cmpf ole, %120, %107 : vector<2x128xf32>
    %cst_5 = arith.constant 1.000000e+00 : f32
    %122 = vector.broadcast %cst_5 : f32 to vector<2x128xf32>
    %123 = arith.addf %116, %122 : vector<2x128xf32>
    %124 = arith.select %121, %123, %116 : vector<2x128xi1>, vector<2x128xf32>
    %cst_6 = arith.constant 6.400000e+01 : f32
    %125 = vector.broadcast %cst_6 : f32 to vector<2x128xf32>
    %126 = arith.mulf %124, %125 : vector<2x128xf32>
    %127 = arith.subf %107, %126 : vector<2x128xf32>
    %cst_7 = arith.constant 1.250000e-01 : f32
    %128 = vector.broadcast %cst_7 : f32 to vector<2x128xf32>
    %129 = arith.mulf %127, %128 : vector<2x128xf32>
    %130 = math.floor %129 : vector<2x128xf32>
    %cst_8 = arith.constant 8.000000e+00 : f32
    %131 = vector.broadcast %cst_8 : f32 to vector<2x128xf32>
    %132 = arith.mulf %130, %131 : vector<2x128xf32>
    %133 = arith.cmpf ogt, %132, %127 : vector<2x128xf32>
    %cst_9 = arith.constant 1.000000e+00 : f32
    %134 = vector.broadcast %cst_9 : f32 to vector<2x128xf32>
    %135 = arith.subf %130, %134 : vector<2x128xf32>
    %136 = arith.select %133, %135, %130 : vector<2x128xi1>, vector<2x128xf32>
    %cst_10 = arith.constant 1.000000e+00 : f32
    %137 = vector.broadcast %cst_10 : f32 to vector<2x128xf32>
    %138 = arith.addf %136, %137 : vector<2x128xf32>
    %cst_11 = arith.constant 8.000000e+00 : f32
    %139 = vector.broadcast %cst_11 : f32 to vector<2x128xf32>
    %140 = arith.mulf %138, %139 : vector<2x128xf32>
    %141 = arith.cmpf ole, %140, %127 : vector<2x128xf32>
    %cst_12 = arith.constant 1.000000e+00 : f32
    %142 = vector.broadcast %cst_12 : f32 to vector<2x128xf32>
    %143 = arith.addf %136, %142 : vector<2x128xf32>
    %144 = arith.select %141, %143, %136 : vector<2x128xi1>, vector<2x128xf32>
    %cst_13 = arith.constant 8.000000e+00 : f32
    %145 = vector.broadcast %cst_13 : f32 to vector<2x128xf32>
    %146 = arith.mulf %144, %145 : vector<2x128xf32>
    %147 = arith.subf %127, %146 : vector<2x128xf32>
    %cst_14 = arith.constant 2.560000e+02 : f32
    %148 = vector.broadcast %cst_14 : f32 to vector<2x128xf32>
    %149 = arith.cmpf olt, %107, %148 : vector<2x128xf32>
    %150 = vector.broadcast %2 : f32 to vector<2x128xf32>
    %151 = arith.subf %150, %124 : vector<2x128xf32>
    %152 = vector.broadcast %8 : f32 to vector<2x128xf32>
    %153 = arith.mulf %151, %152 : vector<2x128xf32>
    %154 = arith.mulf %153, %153 : vector<2x128xf32>
    %155 = vector.broadcast %4 : f32 to vector<2x128xf32>
    %156 = arith.subf %155, %144 : vector<2x128xf32>
    %157 = vector.broadcast %10 : f32 to vector<2x128xf32>
    %158 = arith.mulf %156, %157 : vector<2x128xf32>
    %159 = arith.mulf %158, %158 : vector<2x128xf32>
    %160 = arith.addf %154, %159 : vector<2x128xf32>
    %161 = vector.broadcast %6 : f32 to vector<2x128xf32>
    %162 = arith.subf %161, %147 : vector<2x128xf32>
    %163 = vector.broadcast %12 : f32 to vector<2x128xf32>
    %164 = arith.mulf %162, %163 : vector<2x128xf32>
    %165 = arith.mulf %164, %164 : vector<2x128xf32>
    %166 = arith.addf %160, %165 : vector<2x128xf32>
    %cst_15 = arith.constant 0.000000e+00 : f32
    %167 = vector.broadcast %cst_15 : f32 to vector<2x128xf32>
    %168 = arith.subf %167, %166 : vector<2x128xf32>
    %cst_16 = arith.constant -1.000000e+30 : f32
    %169 = vector.broadcast %cst_16 : f32 to vector<2x128xf32>
    %170 = arith.select %149, %168, %169 : vector<2x128xi1>, vector<2x128xf32>
    %c0_17 = arith.constant 0 : index
    %c0_18 = arith.constant 0 : index
    %c0_19 = arith.constant 0 : index
    %c0_20 = arith.constant 0 : index
    %171 = vector.load %arg3[%c0_17, %c0_18, %c0_19, %c0_20] : memref<1x8x2x128xf32, #tpu.memory_space<vmem>>, vector<1x1x2x128xf32>
    %172 = vector.shape_cast %171 : vector<1x1x2x128xf32> to vector<2x128xf32>
    %173 = vector.shape_cast %170 : vector<2x128xf32> to vector<1x1x2x128xf32>
    tpu.vector_store %arg3[%c0_17, %c0_18, %c0_19, %c0_20], %173 {strides = array<i32>} : memref<1x8x2x128xf32, #tpu.memory_space<vmem>>, vector<1x1x2x128xf32>,
    %174 = vector.broadcast %14 : f32 to vector<2x128xf32>
    %175 = arith.subf %174, %124 : vector<2x128xf32>
    %176 = vector.broadcast %20 : f32 to vector<2x128xf32>
    %177 = arith.mulf %175, %176 : vector<2x128xf32>
    %178 = arith.mulf %177, %177 : vector<2x128xf32>
    %179 = vector.broadcast %16 : f32 to vector<2x128xf32>
    %180 = arith.subf %179, %144 : vector<2x128xf32>
    %181 = vector.broadcast %22 : f32 to vector<2x128xf32>
    %182 = arith.mulf %180, %181 : vector<2x128xf32>
    %183 = arith.mulf %182, %182 : vector<2x128xf32>
    %184 = arith.addf %178, %183 : vector<2x128xf32>
    %185 = vector.broadcast %18 : f32 to vector<2x128xf32>
    %186 = arith.subf %185, %147 : vector<2x128xf32>
    %187 = vector.broadcast %24 : f32 to vector<2x128xf32>
    %188 = arith.mulf %186, %187 : vector<2x128xf32>
    %189 = arith.mulf %188, %188 : vector<2x128xf32>
    %190 = arith.addf %184, %189 : vector<2x128xf32>
    %cst_21 = arith.constant 0.000000e+00 : f32
    %191 = vector.broadcast %cst_21 : f32 to vector<2x128xf32>
    %192 = arith.subf %191, %190 : vector<2x128xf32>
    %cst_22 = arith.constant -1.000000e+30 : f32
    %193 = vector.broadcast %cst_22 : f32 to vector<2x128xf32>
    %194 = arith.select %149, %192, %193 : vector<2x128xi1>, vector<2x128xf32>
    %c0_23 = arith.constant 0 : index
    %c1_24 = arith.constant 1 : index
    %c0_25 = arith.constant 0 : index
    %c0_26 = arith.constant 0 : index
    %195 = vector.load %arg3[%c0_23, %c1_24, %c0_25, %c0_26] : memref<1x8x2x128xf32, #tpu.memory_space<vmem>>, vector<1x1x2x128xf32>
    %196 = vector.shape_cast %195 : vector<1x1x2x128xf32> to vector<2x128xf32>
    %197 = vector.shape_cast %194 : vector<2x128xf32> to vector<1x1x2x128xf32>
    tpu.vector_store %arg3[%c0_23, %c1_24, %c0_25, %c0_26], %197 {strides = array<i32>} : memref<1x8x2x128xf32, #tpu.memory_space<vmem>>, vector<1x1x2x128xf32>,
    %198 = vector.broadcast %26 : f32 to vector<2x128xf32>
    %199 = arith.subf %198, %124 : vector<2x128xf32>
    %200 = vector.broadcast %32 : f32 to vector<2x128xf32>
    %201 = arith.mulf %199, %200 : vector<2x128xf32>
    %202 = arith.mulf %201, %201 : vector<2x128xf32>
    %203 = vector.broadcast %28 : f32 to vector<2x128xf32>
    %204 = arith.subf %203, %144 : vector<2x128xf32>
    %205 = vector.broadcast %34 : f32 to vector<2x128xf32>
    %206 = arith.mulf %204, %205 : vector<2x128xf32>
    %207 = arith.mulf %206, %206 : vector<2x128xf32>
    %208 = arith.addf %202, %207 : vector<2x128xf32>
    %209 = vector.broadcast %30 : f32 to vector<2x128xf32>
    %210 = arith.subf %209, %147 : vector<2x128xf32>
    %211 = vector.broadcast %36 : f32 to vector<2x128xf32>
    %212 = arith.mulf %210, %211 : vector<2x128xf32>
    %213 = arith.mulf %212, %212 : vector<2x128xf32>
    %214 = arith.addf %208, %213 : vector<2x128xf32>
    %cst_27 = arith.constant 0.000000e+00 : f32
    %215 = vector.broadcast %cst_27 : f32 to vector<2x128xf32>
    %216 = arith.subf %215, %214 : vector<2x128xf32>
    %cst_28 = arith.constant -1.000000e+30 : f32
    %217 = vector.broadcast %cst_28 : f32 to vector<2x128xf32>
    %218 = arith.select %149, %216, %217 : vector<2x128xi1>, vector<2x128xf32>
    %c0_29 = arith.constant 0 : index
    %c2_30 = arith.constant 2 : index
    %c0_31 = arith.constant 0 : index
    %c0_32 = arith.constant 0 : index
    %219 = vector.load %arg3[%c0_29, %c2_30, %c0_31, %c0_32] : memref<1x8x2x128xf32, #tpu.memory_space<vmem>>, vector<1x1x2x128xf32>
    %220 = vector.shape_cast %219 : vector<1x1x2x128xf32> to vector<2x128xf32>
    %221 = vector.shape_cast %218 : vector<2x128xf32> to vector<1x1x2x128xf32>
    tpu.vector_store %arg3[%c0_29, %c2_30, %c0_31, %c0_32], %221 {strides = array<i32>} : memref<1x8x2x128xf32, #tpu.memory_space<vmem>>, vector<1x1x2x128xf32>,
    %222 = vector.broadcast %38 : f32 to vector<2x128xf32>
    %223 = arith.subf %222, %124 : vector<2x128xf32>
    %224 = vector.broadcast %44 : f32 to vector<2x128xf32>
    %225 = arith.mulf %223, %224 : vector<2x128xf32>
    %226 = arith.mulf %225, %225 : vector<2x128xf32>
    %227 = vector.broadcast %40 : f32 to vector<2x128xf32>
    %228 = arith.subf %227, %144 : vector<2x128xf32>
    %229 = vector.broadcast %46 : f32 to vector<2x128xf32>
    %230 = arith.mulf %228, %229 : vector<2x128xf32>
    %231 = arith.mulf %230, %230 : vector<2x128xf32>
    %232 = arith.addf %226, %231 : vector<2x128xf32>
    %233 = vector.broadcast %42 : f32 to vector<2x128xf32>
    %234 = arith.subf %233, %147 : vector<2x128xf32>
    %235 = vector.broadcast %48 : f32 to vector<2x128xf32>
    %236 = arith.mulf %234, %235 : vector<2x128xf32>
    %237 = arith.mulf %236, %236 : vector<2x128xf32>
    %238 = arith.addf %232, %237 : vector<2x128xf32>
    %cst_33 = arith.constant 0.000000e+00 : f32
    %239 = vector.broadcast %cst_33 : f32 to vector<2x128xf32>
    %240 = arith.subf %239, %238 : vector<2x128xf32>
    %cst_34 = arith.constant -1.000000e+30 : f32
    %241 = vector.broadcast %cst_34 : f32 to vector<2x128xf32>
    %242 = arith.select %149, %240, %241 : vector<2x128xi1>, vector<2x128xf32>
    %c0_35 = arith.constant 0 : index
    %c3_36 = arith.constant 3 : index
    %c0_37 = arith.constant 0 : index
    %c0_38 = arith.constant 0 : index
    %243 = vector.load %arg3[%c0_35, %c3_36, %c0_37, %c0_38] : memref<1x8x2x128xf32, #tpu.memory_space<vmem>>, vector<1x1x2x128xf32>
    %244 = vector.shape_cast %243 : vector<1x1x2x128xf32> to vector<2x128xf32>
    %245 = vector.shape_cast %242 : vector<2x128xf32> to vector<1x1x2x128xf32>
    tpu.vector_store %arg3[%c0_35, %c3_36, %c0_37, %c0_38], %245 {strides = array<i32>} : memref<1x8x2x128xf32, #tpu.memory_space<vmem>>, vector<1x1x2x128xf32>,
    %246 = vector.broadcast %50 : f32 to vector<2x128xf32>
    %247 = arith.subf %246, %124 : vector<2x128xf32>
    %248 = vector.broadcast %56 : f32 to vector<2x128xf32>
    %249 = arith.mulf %247, %248 : vector<2x128xf32>
    %250 = arith.mulf %249, %249 : vector<2x128xf32>
    %251 = vector.broadcast %52 : f32 to vector<2x128xf32>
    %252 = arith.subf %251, %144 : vector<2x128xf32>
    %253 = vector.broadcast %58 : f32 to vector<2x128xf32>
    %254 = arith.mulf %252, %253 : vector<2x128xf32>
    %255 = arith.mulf %254, %254 : vector<2x128xf32>
    %256 = arith.addf %250, %255 : vector<2x128xf32>
    %257 = vector.broadcast %54 : f32 to vector<2x128xf32>
    %258 = arith.subf %257, %147 : vector<2x128xf32>
    %259 = vector.broadcast %60 : f32 to vector<2x128xf32>
    %260 = arith.mulf %258, %259 : vector<2x128xf32>
    %261 = arith.mulf %260, %260 : vector<2x128xf32>
    %262 = arith.addf %256, %261 : vector<2x128xf32>
    %cst_39 = arith.constant 0.000000e+00 : f32
    %263 = vector.broadcast %cst_39 : f32 to vector<2x128xf32>
    %264 = arith.subf %263, %262 : vector<2x128xf32>
    %cst_40 = arith.constant -1.000000e+30 : f32
    %265 = vector.broadcast %cst_40 : f32 to vector<2x128xf32>
    %266 = arith.select %149, %264, %265 : vector<2x128xi1>, vector<2x128xf32>
    %c0_41 = arith.constant 0 : index
    %c4_42 = arith.constant 4 : index
    %c0_43 = arith.constant 0 : index
    %c0_44 = arith.constant 0 : index
    %267 = vector.load %arg3[%c0_41, %c4_42, %c0_43, %c0_44] : memref<1x8x2x128xf32, #tpu.memory_space<vmem>>, vector<1x1x2x128xf32>
    %268 = vector.shape_cast %267 : vector<1x1x2x128xf32> to vector<2x128xf32>
    %269 = vector.shape_cast %266 : vector<2x128xf32> to vector<1x1x2x128xf32>
    tpu.vector_store %arg3[%c0_41, %c4_42, %c0_43, %c0_44], %269 {strides = array<i32>} : memref<1x8x2x128xf32, #tpu.memory_space<vmem>>, vector<1x1x2x128xf32>,
    %270 = vector.broadcast %62 : f32 to vector<2x128xf32>
    %271 = arith.subf %270, %124 : vector<2x128xf32>
    %272 = vector.broadcast %68 : f32 to vector<2x128xf32>
    %273 = arith.mulf %271, %272 : vector<2x128xf32>
    %274 = arith.mulf %273, %273 : vector<2x128xf32>
    %275 = vector.broadcast %64 : f32 to vector<2x128xf32>
    %276 = arith.subf %275, %144 : vector<2x128xf32>
    %277 = vector.broadcast %70 : f32 to vector<2x128xf32>
    %278 = arith.mulf %276, %277 : vector<2x128xf32>
    %279 = arith.mulf %278, %278 : vector<2x128xf32>
    %280 = arith.addf %274, %279 : vector<2x128xf32>
    %281 = vector.broadcast %66 : f32 to vector<2x128xf32>
    %282 = arith.subf %281, %147 : vector<2x128xf32>
    %283 = vector.broadcast %72 : f32 to vector<2x128xf32>
    %284 = arith.mulf %282, %283 : vector<2x128xf32>
    %285 = arith.mulf %284, %284 : vector<2x128xf32>
    %286 = arith.addf %280, %285 : vector<2x128xf32>
    %cst_45 = arith.constant 0.000000e+00 : f32
    %287 = vector.broadcast %cst_45 : f32 to vector<2x128xf32>
    %288 = arith.subf %287, %286 : vector<2x128xf32>
    %cst_46 = arith.constant -1.000000e+30 : f32
    %289 = vector.broadcast %cst_46 : f32 to vector<2x128xf32>
    %290 = arith.select %149, %288, %289 : vector<2x128xi1>, vector<2x128xf32>
    %c0_47 = arith.constant 0 : index
    %c5_48 = arith.constant 5 : index
    %c0_49 = arith.constant 0 : index
    %c0_50 = arith.constant 0 : index
    %291 = vector.load %arg3[%c0_47, %c5_48, %c0_49, %c0_50] : memref<1x8x2x128xf32, #tpu.memory_space<vmem>>, vector<1x1x2x128xf32>
    %292 = vector.shape_cast %291 : vector<1x1x2x128xf32> to vector<2x128xf32>
    %293 = vector.shape_cast %290 : vector<2x128xf32> to vector<1x1x2x128xf32>
    tpu.vector_store %arg3[%c0_47, %c5_48, %c0_49, %c0_50], %293 {strides = array<i32>} : memref<1x8x2x128xf32, #tpu.memory_space<vmem>>, vector<1x1x2x128xf32>,
    %294 = vector.broadcast %74 : f32 to vector<2x128xf32>
    %295 = arith.subf %294, %124 : vector<2x128xf32>
    %296 = vector.broadcast %80 : f32 to vector<2x128xf32>
    %297 = arith.mulf %295, %296 : vector<2x128xf32>
    %298 = arith.mulf %297, %297 : vector<2x128xf32>
    %299 = vector.broadcast %76 : f32 to vector<2x128xf32>
    %300 = arith.subf %299, %144 : vector<2x128xf32>
    %301 = vector.broadcast %82 : f32 to vector<2x128xf32>
    %302 = arith.mulf %300, %301 : vector<2x128xf32>
    %303 = arith.mulf %302, %302 : vector<2x128xf32>
    %304 = arith.addf %298, %303 : vector<2x128xf32>
    %305 = vector.broadcast %78 : f32 to vector<2x128xf32>
    %306 = arith.subf %305, %147 : vector<2x128xf32>
    %307 = vector.broadcast %84 : f32 to vector<2x128xf32>
    %308 = arith.mulf %306, %307 : vector<2x128xf32>
    %309 = arith.mulf %308, %308 : vector<2x128xf32>
    %310 = arith.addf %304, %309 : vector<2x128xf32>
    %cst_51 = arith.constant 0.000000e+00 : f32
    %311 = vector.broadcast %cst_51 : f32 to vector<2x128xf32>
    %312 = arith.subf %311, %310 : vector<2x128xf32>
    %cst_52 = arith.constant -1.000000e+30 : f32
    %313 = vector.broadcast %cst_52 : f32 to vector<2x128xf32>
    %314 = arith.select %149, %312, %313 : vector<2x128xi1>, vector<2x128xf32>
    %c0_53 = arith.constant 0 : index
    %c6_54 = arith.constant 6 : index
    %c0_55 = arith.constant 0 : index
    %c0_56 = arith.constant 0 : index
    %315 = vector.load %arg3[%c0_53, %c6_54, %c0_55, %c0_56] : memref<1x8x2x128xf32, #tpu.memory_space<vmem>>, vector<1x1x2x128xf32>
    %316 = vector.shape_cast %315 : vector<1x1x2x128xf32> to vector<2x128xf32>
    %317 = vector.shape_cast %314 : vector<2x128xf32> to vector<1x1x2x128xf32>
    tpu.vector_store %arg3[%c0_53, %c6_54, %c0_55, %c0_56], %317 {strides = array<i32>} : memref<1x8x2x128xf32, #tpu.memory_space<vmem>>, vector<1x1x2x128xf32>,
    %318 = vector.broadcast %86 : f32 to vector<2x128xf32>
    %319 = arith.subf %318, %124 : vector<2x128xf32>
    %320 = vector.broadcast %92 : f32 to vector<2x128xf32>
    %321 = arith.mulf %319, %320 : vector<2x128xf32>
    %322 = arith.mulf %321, %321 : vector<2x128xf32>
    %323 = vector.broadcast %88 : f32 to vector<2x128xf32>
    %324 = arith.subf %323, %144 : vector<2x128xf32>
    %325 = vector.broadcast %94 : f32 to vector<2x128xf32>
    %326 = arith.mulf %324, %325 : vector<2x128xf32>
    %327 = arith.mulf %326, %326 : vector<2x128xf32>
    %328 = arith.addf %322, %327 : vector<2x128xf32>
    %329 = vector.broadcast %90 : f32 to vector<2x128xf32>
    %330 = arith.subf %329, %147 : vector<2x128xf32>
    %331 = vector.broadcast %96 : f32 to vector<2x128xf32>
    %332 = arith.mulf %330, %331 : vector<2x128xf32>
    %333 = arith.mulf %332, %332 : vector<2x128xf32>
    %334 = arith.addf %328, %333 : vector<2x128xf32>
    %cst_57 = arith.constant 0.000000e+00 : f32
    %335 = vector.broadcast %cst_57 : f32 to vector<2x128xf32>
    %336 = arith.subf %335, %334 : vector<2x128xf32>
    %cst_58 = arith.constant -1.000000e+30 : f32
    %337 = vector.broadcast %cst_58 : f32 to vector<2x128xf32>
    %338 = arith.select %149, %336, %337 : vector<2x128xi1>, vector<2x128xf32>
    %c0_59 = arith.constant 0 : index
    %c7_60 = arith.constant 7 : index
    %c0_61 = arith.constant 0 : index
    %c0_62 = arith.constant 0 : index
    %339 = vector.load %arg3[%c0_59, %c7_60, %c0_61, %c0_62] : memref<1x8x2x128xf32, #tpu.memory_space<vmem>>, vector<1x1x2x128xf32>
    %340 = vector.shape_cast %339 : vector<1x1x2x128xf32> to vector<2x128xf32>
    %341 = vector.shape_cast %338 : vector<2x128xf32> to vector<1x1x2x128xf32>
    tpu.vector_store %arg3[%c0_59, %c7_60, %c0_61, %c0_62], %341 {strides = array<i32>} : memref<1x8x2x128xf32, #tpu.memory_space<vmem>>, vector<1x1x2x128xf32>,
    return
  }
  func.func @transform_0(%arg0: i32, %arg1: i32) -> (i32, i32) {
    %c0_i32 = arith.constant 0 : i32
    %c0_i32_0 = arith.constant 0 : i32
    %c0_i32_1 = arith.constant 0 : i32
    return %c0_i32, %c0_i32_0 : i32, i32
  }
  func.func @transform_1(%arg0: i32, %arg1: i32) -> (i32, i32, i32, i32) {
    %c0_i32 = arith.constant 0 : i32
    %c0_i32_0 = arith.constant 0 : i32
    %c0_i32_1 = arith.constant 0 : i32
    return %arg0, %c0_i32, %arg1, %c0_i32_0 : i32, i32, i32, i32
  }
}

module attributes {stable_mosaic.version = 11 : i64} {
  func.func @_fused_loss_kernel(%arg0: i32, %arg1: i32, %arg2: i32, %arg3: memref<2xi32, #tpu.memory_space<smem>>, %arg4: memref<1x2x128xf32, #tpu.memory_space<vmem>>, %arg5: memref<1x2x128xf32, #tpu.memory_space<vmem>>, %arg6: memref<1x2x128xf32, #tpu.memory_space<vmem>>, %arg7: memref<1x3x2x128xf32, #tpu.memory_space<vmem>>, %arg8: memref<1x3x2x128xf32, #tpu.memory_space<vmem>>, %arg9: memref<1x6x2x128xf32, #tpu.memory_space<vmem>>, %arg10: memref<1x2x128xf32, #tpu.memory_space<vmem>>, %arg11: memref<1x1x4x128xf32, #tpu.memory_space<vmem>>) attributes {dimension_semantics = [#tpu.dimension_semantics<parallel>, #tpu.dimension_semantics<parallel>, #tpu.dimension_semantics<arbitrary>], iteration_bounds = array<i64: 2, 1, 1>, scalar_prefetch = 1 : i64, scratch_operands = 0 : i64, tpu.core_type = #tpu.core_type<tc>, window_params = [{transform_indices = @transform_0, window_bounds = array<i64: 1, 2, 128>}, {transform_indices = @transform_1, window_bounds = array<i64: 1, 2, 128>}, {transform_indices = @transform_2, window_bounds = array<i64: 1, 2, 128>}, {transform_indices = @transform_3, window_bounds = array<i64: 1, 3, 2, 128>}, {transform_indices = @transform_4, window_bounds = array<i64: 1, 3, 2, 128>}, {transform_indices = @transform_5, window_bounds = array<i64: 1, 6, 2, 128>}, {transform_indices = @transform_6, window_bounds = array<i64: 1, 2, 128>}, {transform_indices = @transform_7, window_bounds = array<i64: 1, 1, 4, 128>}]} {
    %c1_i32 = arith.constant 1 : i32
    %0 = arith.muli %arg1, %c1_i32 : i32
    %1 = arith.addi %0, %arg2 : i32
    %c256_i32 = arith.constant 256 : i32
    %2 = arith.muli %1, %c256_i32 : i32
    %3 = arith.index_cast %arg0 : i32 to index
    %4 = memref.load %arg3[%3] : memref<2xi32, #tpu.memory_space<smem>>
    %c0_i32 = arith.constant 0 : i32
    %5 = arith.cmpi sgt, %4, %c0_i32 : i32
    %c0_i32_0 = arith.constant 0 : i32
    %6 = arith.cmpi eq, %arg2, %c0_i32_0 : i32
    %7 = arith.extui %6 : i1 to i32
    %c0_i32_1 = arith.constant 0 : i32
    %8 = arith.cmpi ne, %7, %c0_i32_1 : i32
    scf.if %8 {
      %cst_150 = arith.constant 0.000000e+00 : f32
      %321 = vector.broadcast %cst_150 : f32 to vector<1x1x4x128xf32>
      %c0_151 = arith.constant 0 : index
      %c0_152 = arith.constant 0 : index
      %c0_153 = arith.constant 0 : index
      %c0_154 = arith.constant 0 : index
      %322 = vector.load %arg11[%c0_151, %c0_152, %c0_153, %c0_154] : memref<1x1x4x128xf32, #tpu.memory_space<vmem>>, vector<1x1x4x128xf32>
      tpu.vector_store %arg11[%c0_151, %c0_152, %c0_153, %c0_154], %321 {strides = array<i32>} : memref<1x1x4x128xf32, #tpu.memory_space<vmem>>, vector<1x1x4x128xf32>,
    } else {
    }
    %cst = arith.constant 0.000000e+00 : f32
    %9 = vector.broadcast %cst : f32 to vector<1x128xf32>
    %c0 = arith.constant 0 : index
    %c0_2 = arith.constant 0 : index
    %c0_3 = arith.constant 0 : index
    %10 = vector.load %arg4[%c0, %c0_2, %c0_3] : memref<1x2x128xf32, #tpu.memory_space<vmem>>, vector<1x2x128xf32>
    %11 = vector.shape_cast %10 : vector<1x2x128xf32> to vector<2x128xf32>
    %c0_4 = arith.constant 0 : index
    %c0_5 = arith.constant 0 : index
    %c0_6 = arith.constant 0 : index
    %12 = vector.load %arg5[%c0_4, %c0_5, %c0_6] : memref<1x2x128xf32, #tpu.memory_space<vmem>>, vector<1x2x128xf32>
    %13 = vector.shape_cast %12 : vector<1x2x128xf32> to vector<2x128xf32>
    %c0_7 = arith.constant 0 : index
    %c0_8 = arith.constant 0 : index
    %c0_9 = arith.constant 0 : index
    %14 = vector.load %arg6[%c0_7, %c0_8, %c0_9] : memref<1x2x128xf32, #tpu.memory_space<vmem>>, vector<1x2x128xf32>
    %15 = vector.shape_cast %14 : vector<1x2x128xf32> to vector<2x128xf32>
    %c0_i32_10 = arith.constant 0 : i32
    %16 = arith.addi %2, %c0_i32_10 : i32
    %17 = tpu.iota {dimensions = array<i32: 0>} : vector<2x128xi32>
    %18 = arith.sitofp %17 : vector<2x128xi32> to vector<2x128xf32>
    %19 = tpu.iota {dimensions = array<i32: 1>} : vector<2x128xi32>
    %20 = arith.sitofp %19 : vector<2x128xi32> to vector<2x128xf32>
    %21 = arith.sitofp %16 : i32 to f32
    %cst_11 = arith.constant 1.280000e+02 : f32
    %22 = vector.broadcast %cst_11 : f32 to vector<2x128xf32>
    %23 = arith.mulf %18, %22 : vector<2x128xf32>
    %24 = vector.broadcast %21 : f32 to vector<2x128xf32>
    %25 = arith.addf %24, %23 : vector<2x128xf32>
    %26 = arith.addf %25, %20 : vector<2x128xf32>
    %cst_12 = arith.constant 1.562500e-02 : f32
    %27 = vector.broadcast %cst_12 : f32 to vector<2x128xf32>
    %28 = arith.mulf %26, %27 : vector<2x128xf32>
    %29 = math.floor %28 : vector<2x128xf32>
    %cst_13 = arith.constant 6.400000e+01 : f32
    %30 = vector.broadcast %cst_13 : f32 to vector<2x128xf32>
    %31 = arith.mulf %29, %30 : vector<2x128xf32>
    %32 = arith.cmpf ogt, %31, %26 : vector<2x128xf32>
    %cst_14 = arith.constant 1.000000e+00 : f32
    %33 = vector.broadcast %cst_14 : f32 to vector<2x128xf32>
    %34 = arith.subf %29, %33 : vector<2x128xf32>
    %35 = arith.select %32, %34, %29 : vector<2x128xi1>, vector<2x128xf32>
    %cst_15 = arith.constant 1.000000e+00 : f32
    %36 = vector.broadcast %cst_15 : f32 to vector<2x128xf32>
    %37 = arith.addf %35, %36 : vector<2x128xf32>
    %cst_16 = arith.constant 6.400000e+01 : f32
    %38 = vector.broadcast %cst_16 : f32 to vector<2x128xf32>
    %39 = arith.mulf %37, %38 : vector<2x128xf32>
    %40 = arith.cmpf ole, %39, %26 : vector<2x128xf32>
    %cst_17 = arith.constant 1.000000e+00 : f32
    %41 = vector.broadcast %cst_17 : f32 to vector<2x128xf32>
    %42 = arith.addf %35, %41 : vector<2x128xf32>
    %43 = arith.select %40, %42, %35 : vector<2x128xi1>, vector<2x128xf32>
    %cst_18 = arith.constant 6.400000e+01 : f32
    %44 = vector.broadcast %cst_18 : f32 to vector<2x128xf32>
    %45 = arith.mulf %43, %44 : vector<2x128xf32>
    %46 = arith.subf %26, %45 : vector<2x128xf32>
    %cst_19 = arith.constant 1.250000e-01 : f32
    %47 = vector.broadcast %cst_19 : f32 to vector<2x128xf32>
    %48 = arith.mulf %46, %47 : vector<2x128xf32>
    %49 = math.floor %48 : vector<2x128xf32>
    %cst_20 = arith.constant 8.000000e+00 : f32
    %50 = vector.broadcast %cst_20 : f32 to vector<2x128xf32>
    %51 = arith.mulf %49, %50 : vector<2x128xf32>
    %52 = arith.cmpf ogt, %51, %46 : vector<2x128xf32>
    %cst_21 = arith.constant 1.000000e+00 : f32
    %53 = vector.broadcast %cst_21 : f32 to vector<2x128xf32>
    %54 = arith.subf %49, %53 : vector<2x128xf32>
    %55 = arith.select %52, %54, %49 : vector<2x128xi1>, vector<2x128xf32>
    %cst_22 = arith.constant 1.000000e+00 : f32
    %56 = vector.broadcast %cst_22 : f32 to vector<2x128xf32>
    %57 = arith.addf %55, %56 : vector<2x128xf32>
    %cst_23 = arith.constant 8.000000e+00 : f32
    %58 = vector.broadcast %cst_23 : f32 to vector<2x128xf32>
    %59 = arith.mulf %57, %58 : vector<2x128xf32>
    %60 = arith.cmpf ole, %59, %46 : vector<2x128xf32>
    %cst_24 = arith.constant 1.000000e+00 : f32
    %61 = vector.broadcast %cst_24 : f32 to vector<2x128xf32>
    %62 = arith.addf %55, %61 : vector<2x128xf32>
    %63 = arith.select %60, %62, %55 : vector<2x128xi1>, vector<2x128xf32>
    %cst_25 = arith.constant 8.000000e+00 : f32
    %64 = vector.broadcast %cst_25 : f32 to vector<2x128xf32>
    %65 = arith.mulf %63, %64 : vector<2x128xf32>
    %66 = arith.subf %46, %65 : vector<2x128xf32>
    %cst_26 = arith.constant 2.560000e+02 : f32
    %67 = vector.broadcast %cst_26 : f32 to vector<2x128xf32>
    %68 = arith.cmpf olt, %26, %67 : vector<2x128xf32>
    %69 = math.absf %11 : vector<2x128xf32>
    %cst_27 = arith.constant 0.000000e+00 : f32
    %70 = vector.broadcast %cst_27 : f32 to vector<2x128xf32>
    %71 = arith.subf %70, %69 : vector<2x128xf32>
    %72 = math.exp %71 : vector<2x128xf32>
    %cst_28 = arith.constant 1.000000e+00 : f32
    %73 = vector.broadcast %cst_28 : f32 to vector<2x128xf32>
    %74 = arith.addf %73, %72 : vector<2x128xf32>
    %cst_29 = arith.constant 1.000000e+00 : f32
    %75 = vector.broadcast %cst_29 : f32 to vector<2x128xf32>
    %76 = arith.divf %75, %74 : vector<2x128xf32>
    %cst_30 = arith.constant 0.000000e+00 : f32
    %77 = vector.broadcast %cst_30 : f32 to vector<2x128xf32>
    %78 = arith.cmpf oge, %11, %77 : vector<2x128xf32>
    %79 = arith.mulf %72, %76 : vector<2x128xf32>
    %80 = arith.select %78, %76, %79 : vector<2x128xi1>, vector<2x128xf32>
    %cst_31 = arith.constant 9.99999974E-5 : f32
    %cst_32 = arith.constant 0.999899983 : f32
    %81 = vector.broadcast %cst_31 : f32 to vector<2x128xf32>
    %82 = arith.maximumf %81, %80 : vector<2x128xf32>
    %83 = vector.broadcast %cst_32 : f32 to vector<2x128xf32>
    %84 = arith.minimumf %83, %82 : vector<2x128xf32>
    %cst_33 = arith.constant 1.000000e+00 : f32
    %85 = vector.broadcast %cst_33 : f32 to vector<2x128xf32>
    %86 = arith.cmpf oeq, %13, %85 : vector<2x128xf32>
    %cst_34 = arith.constant 7.500000e-01 : f32
    %cst_35 = arith.constant 2.500000e-01 : f32
    %87 = vector.broadcast %cst_34 : f32 to vector<2x128xf32>
    %88 = vector.broadcast %cst_35 : f32 to vector<2x128xf32>
    %89 = arith.select %86, %87, %88 : vector<2x128xi1>, vector<2x128xf32>
    %cst_36 = arith.constant 1.000000e+00 : f32
    %90 = vector.broadcast %cst_36 : f32 to vector<2x128xf32>
    %91 = arith.subf %90, %84 : vector<2x128xf32>
    %92 = arith.select %86, %91, %84 : vector<2x128xi1>, vector<2x128xf32>
    %93 = arith.mulf %92, %92 : vector<2x128xf32>
    %cst_37 = arith.constant 0.000000e+00 : f32
    %94 = vector.broadcast %cst_37 : f32 to vector<2x128xf32>
    %95 = arith.maximumf %11, %94 : vector<2x128xf32>
    %96 = arith.mulf %11, %13 : vector<2x128xf32>
    %97 = arith.subf %95, %96 : vector<2x128xf32>
    %cst_38 = arith.constant 1.000000e+00 : f32
    %98 = vector.broadcast %cst_38 : f32 to vector<2x128xf32>
    %99 = arith.addf %98, %72 : vector<2x128xf32>
    %100 = math.log %99 : vector<2x128xf32>
    %101 = arith.addf %97, %100 : vector<2x128xf32>
    %102 = arith.mulf %89, %93 : vector<2x128xf32>
    %103 = arith.mulf %102, %101 : vector<2x128xf32>
    %cst_39 = arith.constant 0.000000e+00 : f32
    %104 = vector.broadcast %cst_39 : f32 to vector<2x128xf32>
    %105 = arith.cmpf oeq, %15, %104 : vector<2x128xf32>
    %106 = arith.andi %105, %68 : vector<2x128xi1>
    %cst_40 = arith.constant 0.000000e+00 : f32
    %107 = vector.broadcast %cst_40 : f32 to vector<2x128xf32>
    %108 = arith.select %106, %103, %107 : vector<2x128xi1>, vector<2x128xf32>
    %cst_41 = arith.constant 8.000000e-01 : f32
    %109 = vector.broadcast %cst_41 : f32 to vector<2x128xf32>
    %110 = arith.cmpf olt, %84, %109 : vector<2x128xf32>
    %111 = arith.andi %110, %86 : vector<2x128xi1>
    %112 = vector.broadcast %5 : i1 to vector<2x128xi1>
    %113 = arith.andi %112, %111 : vector<2x128xi1>
    %cst_42 = arith.constant 4.000000e+00 : f32
    %114 = vector.broadcast %cst_42 : f32 to vector<2x128xf32>
    %115 = arith.mulf %108, %114 : vector<2x128xf32>
    %116 = arith.select %113, %115, %108 : vector<2x128xi1>, vector<2x128xf32>
    %c0_43 = arith.constant 0 : index
    %c0_44 = arith.constant 0 : index
    %c0_45 = arith.constant 0 : index
    %117 = vector.load %arg10[%c0_43, %c0_44, %c0_45] : memref<1x2x128xf32, #tpu.memory_space<vmem>>, vector<1x2x128xf32>
    %118 = vector.shape_cast %117 : vector<1x2x128xf32> to vector<2x128xf32>
    %119 = vector.shape_cast %116 : vector<2x128xf32> to vector<1x2x128xf32>
    tpu.vector_store %arg10[%c0_43, %c0_44, %c0_45], %119 {strides = array<i32>} : memref<1x2x128xf32, #tpu.memory_space<vmem>>, vector<1x2x128xf32>,
    %c0_46 = arith.constant 0 : index
    %c0_47 = arith.constant 0 : index
    %c0_48 = arith.constant 0 : index
    %c0_49 = arith.constant 0 : index
    %120 = vector.load %arg7[%c0_46, %c0_47, %c0_48, %c0_49] : memref<1x3x2x128xf32, #tpu.memory_space<vmem>>, vector<1x1x2x128xf32>
    %121 = vector.shape_cast %120 : vector<1x1x2x128xf32> to vector<2x128xf32>
    %c0_50 = arith.constant 0 : index
    %c0_51 = arith.constant 0 : index
    %c0_52 = arith.constant 0 : index
    %c0_53 = arith.constant 0 : index
    %122 = vector.load %arg8[%c0_50, %c0_51, %c0_52, %c0_53] : memref<1x3x2x128xf32, #tpu.memory_space<vmem>>, vector<1x1x2x128xf32>
    %123 = vector.shape_cast %122 : vector<1x1x2x128xf32> to vector<2x128xf32>
    %c0_54 = arith.constant 0 : index
    %c0_55 = arith.constant 0 : index
    %c0_56 = arith.constant 0 : index
    %c0_57 = arith.constant 0 : index
    %124 = vector.load %arg9[%c0_54, %c0_55, %c0_56, %c0_57] : memref<1x6x2x128xf32, #tpu.memory_space<vmem>>, vector<1x1x2x128xf32>
    %125 = vector.shape_cast %124 : vector<1x1x2x128xf32> to vector<2x128xf32>
    %c0_58 = arith.constant 0 : index
    %c3 = arith.constant 3 : index
    %c0_59 = arith.constant 0 : index
    %c0_60 = arith.constant 0 : index
    %126 = vector.load %arg9[%c0_58, %c3, %c0_59, %c0_60] : memref<1x6x2x128xf32, #tpu.memory_space<vmem>>, vector<1x1x2x128xf32>
    %127 = vector.shape_cast %126 : vector<1x1x2x128xf32> to vector<2x128xf32>
    %cst_61 = arith.constant 5.000000e-01 : f32
    %128 = vector.broadcast %cst_61 : f32 to vector<2x128xf32>
    %129 = arith.mulf %127, %128 : vector<2x128xf32>
    %130 = arith.subf %123, %129 : vector<2x128xf32>
    %131 = math.absf %130 : vector<2x128xf32>
    %cst_62 = arith.constant 2.500000e-01 : f32
    %132 = vector.broadcast %cst_62 : f32 to vector<2x128xf32>
    %133 = arith.mulf %125, %132 : vector<2x128xf32>
    %134 = arith.subf %133, %43 : vector<2x128xf32>
    %135 = arith.subf %121, %134 : vector<2x128xf32>
    %136 = math.absf %135 : vector<2x128xf32>
    %137 = arith.addf %43, %121 : vector<2x128xf32>
    %cst_63 = arith.constant 4.000000e+00 : f32
    %138 = vector.broadcast %cst_63 : f32 to vector<2x128xf32>
    %139 = arith.mulf %137, %138 : vector<2x128xf32>
    %140 = arith.subf %139, %123 : vector<2x128xf32>
    %141 = arith.addf %139, %123 : vector<2x128xf32>
    %cst_64 = arith.constant 5.000000e-01 : f32
    %142 = vector.broadcast %cst_64 : f32 to vector<2x128xf32>
    %143 = arith.mulf %127, %142 : vector<2x128xf32>
    %144 = arith.subf %125, %143 : vector<2x128xf32>
    %cst_65 = arith.constant 5.000000e-01 : f32
    %145 = vector.broadcast %cst_65 : f32 to vector<2x128xf32>
    %146 = arith.mulf %127, %145 : vector<2x128xf32>
    %147 = arith.addf %125, %146 : vector<2x128xf32>
    %148 = arith.minimumf %141, %147 : vector<2x128xf32>
    %149 = arith.maximumf %140, %144 : vector<2x128xf32>
    %150 = arith.subf %148, %149 : vector<2x128xf32>
    %cst_66 = arith.constant 0.000000e+00 : f32
    %151 = vector.broadcast %cst_66 : f32 to vector<2x128xf32>
    %152 = arith.maximumf %150, %151 : vector<2x128xf32>
    %153 = arith.subf %141, %140 : vector<2x128xf32>
    %154 = arith.subf %147, %144 : vector<2x128xf32>
    %155 = arith.maximumf %141, %147 : vector<2x128xf32>
    %156 = arith.minimumf %140, %144 : vector<2x128xf32>
    %157 = arith.subf %155, %156 : vector<2x128xf32>
    %158 = arith.addf %144, %147 : vector<2x128xf32>
    %159 = arith.subf %158, %140 : vector<2x128xf32>
    %160 = arith.subf %159, %141 : vector<2x128xf32>
    %161 = arith.mulf %157, %157 : vector<2x128xf32>
    %162 = arith.mulf %160, %160 : vector<2x128xf32>
    %c0_67 = arith.constant 0 : index
    %c1 = arith.constant 1 : index
    %c0_68 = arith.constant 0 : index
    %c0_69 = arith.constant 0 : index
    %163 = vector.load %arg7[%c0_67, %c1, %c0_68, %c0_69] : memref<1x3x2x128xf32, #tpu.memory_space<vmem>>, vector<1x1x2x128xf32>
    %164 = vector.shape_cast %163 : vector<1x1x2x128xf32> to vector<2x128xf32>
    %c0_70 = arith.constant 0 : index
    %c1_71 = arith.constant 1 : index
    %c0_72 = arith.constant 0 : index
    %c0_73 = arith.constant 0 : index
    %165 = vector.load %arg8[%c0_70, %c1_71, %c0_72, %c0_73] : memref<1x3x2x128xf32, #tpu.memory_space<vmem>>, vector<1x1x2x128xf32>
    %166 = vector.shape_cast %165 : vector<1x1x2x128xf32> to vector<2x128xf32>
    %c0_74 = arith.constant 0 : index
    %c1_75 = arith.constant 1 : index
    %c0_76 = arith.constant 0 : index
    %c0_77 = arith.constant 0 : index
    %167 = vector.load %arg9[%c0_74, %c1_75, %c0_76, %c0_77] : memref<1x6x2x128xf32, #tpu.memory_space<vmem>>, vector<1x1x2x128xf32>
    %168 = vector.shape_cast %167 : vector<1x1x2x128xf32> to vector<2x128xf32>
    %c0_78 = arith.constant 0 : index
    %c4 = arith.constant 4 : index
    %c0_79 = arith.constant 0 : index
    %c0_80 = arith.constant 0 : index
    %169 = vector.load %arg9[%c0_78, %c4, %c0_79, %c0_80] : memref<1x6x2x128xf32, #tpu.memory_space<vmem>>, vector<1x1x2x128xf32>
    %170 = vector.shape_cast %169 : vector<1x1x2x128xf32> to vector<2x128xf32>
    %cst_81 = arith.constant 5.000000e-01 : f32
    %171 = vector.broadcast %cst_81 : f32 to vector<2x128xf32>
    %172 = arith.mulf %170, %171 : vector<2x128xf32>
    %173 = arith.subf %166, %172 : vector<2x128xf32>
    %174 = math.absf %173 : vector<2x128xf32>
    %cst_82 = arith.constant 2.500000e-01 : f32
    %175 = vector.broadcast %cst_82 : f32 to vector<2x128xf32>
    %176 = arith.mulf %168, %175 : vector<2x128xf32>
    %177 = arith.subf %176, %63 : vector<2x128xf32>
    %178 = arith.subf %164, %177 : vector<2x128xf32>
    %179 = math.absf %178 : vector<2x128xf32>
    %180 = arith.addf %131, %174 : vector<2x128xf32>
    %181 = arith.addf %136, %179 : vector<2x128xf32>
    %182 = arith.addf %63, %164 : vector<2x128xf32>
    %cst_83 = arith.constant 4.000000e+00 : f32
    %183 = vector.broadcast %cst_83 : f32 to vector<2x128xf32>
    %184 = arith.mulf %182, %183 : vector<2x128xf32>
    %185 = arith.subf %184, %166 : vector<2x128xf32>
    %186 = arith.addf %184, %166 : vector<2x128xf32>
    %cst_84 = arith.constant 5.000000e-01 : f32
    %187 = vector.broadcast %cst_84 : f32 to vector<2x128xf32>
    %188 = arith.mulf %170, %187 : vector<2x128xf32>
    %189 = arith.subf %168, %188 : vector<2x128xf32>
    %cst_85 = arith.constant 5.000000e-01 : f32
    %190 = vector.broadcast %cst_85 : f32 to vector<2x128xf32>
    %191 = arith.mulf %170, %190 : vector<2x128xf32>
    %192 = arith.addf %168, %191 : vector<2x128xf32>
    %193 = arith.minimumf %186, %192 : vector<2x128xf32>
    %194 = arith.maximumf %185, %189 : vector<2x128xf32>
    %195 = arith.subf %193, %194 : vector<2x128xf32>
    %cst_86 = arith.constant 0.000000e+00 : f32
    %196 = vector.broadcast %cst_86 : f32 to vector<2x128xf32>
    %197 = arith.maximumf %195, %196 : vector<2x128xf32>
    %198 = arith.subf %186, %185 : vector<2x128xf32>
    %199 = arith.subf %192, %189 : vector<2x128xf32>
    %200 = arith.maximumf %186, %192 : vector<2x128xf32>
    %201 = arith.minimumf %185, %189 : vector<2x128xf32>
    %202 = arith.subf %200, %201 : vector<2x128xf32>
    %203 = arith.addf %189, %192 : vector<2x128xf32>
    %204 = arith.subf %203, %185 : vector<2x128xf32>
    %205 = arith.subf %204, %186 : vector<2x128xf32>
    %206 = arith.mulf %152, %197 : vector<2x128xf32>
    %207 = arith.mulf %153, %198 : vector<2x128xf32>
    %208 = arith.mulf %154, %199 : vector<2x128xf32>
    %209 = arith.mulf %202, %202 : vector<2x128xf32>
    %210 = arith.addf %161, %209 : vector<2x128xf32>
    %211 = arith.mulf %205, %205 : vector<2x128xf32>
    %212 = arith.addf %162, %211 : vector<2x128xf32>
    %c0_87 = arith.constant 0 : index
    %c2 = arith.constant 2 : index
    %c0_88 = arith.constant 0 : index
    %c0_89 = arith.constant 0 : index
    %213 = vector.load %arg7[%c0_87, %c2, %c0_88, %c0_89] : memref<1x3x2x128xf32, #tpu.memory_space<vmem>>, vector<1x1x2x128xf32>
    %214 = vector.shape_cast %213 : vector<1x1x2x128xf32> to vector<2x128xf32>
    %c0_90 = arith.constant 0 : index
    %c2_91 = arith.constant 2 : index
    %c0_92 = arith.constant 0 : index
    %c0_93 = arith.constant 0 : index
    %215 = vector.load %arg8[%c0_90, %c2_91, %c0_92, %c0_93] : memref<1x3x2x128xf32, #tpu.memory_space<vmem>>, vector<1x1x2x128xf32>
    %216 = vector.shape_cast %215 : vector<1x1x2x128xf32> to vector<2x128xf32>
    %c0_94 = arith.constant 0 : index
    %c2_95 = arith.constant 2 : index
    %c0_96 = arith.constant 0 : index
    %c0_97 = arith.constant 0 : index
    %217 = vector.load %arg9[%c0_94, %c2_95, %c0_96, %c0_97] : memref<1x6x2x128xf32, #tpu.memory_space<vmem>>, vector<1x1x2x128xf32>
    %218 = vector.shape_cast %217 : vector<1x1x2x128xf32> to vector<2x128xf32>
    %c0_98 = arith.constant 0 : index
    %c5 = arith.constant 5 : index
    %c0_99 = arith.constant 0 : index
    %c0_100 = arith.constant 0 : index
    %219 = vector.load %arg9[%c0_98, %c5, %c0_99, %c0_100] : memref<1x6x2x128xf32, #tpu.memory_space<vmem>>, vector<1x1x2x128xf32>
    %220 = vector.shape_cast %219 : vector<1x1x2x128xf32> to vector<2x128xf32>
    %cst_101 = arith.constant 5.000000e-01 : f32
    %221 = vector.broadcast %cst_101 : f32 to vector<2x128xf32>
    %222 = arith.mulf %220, %221 : vector<2x128xf32>
    %223 = arith.subf %216, %222 : vector<2x128xf32>
    %224 = math.absf %223 : vector<2x128xf32>
    %cst_102 = arith.constant 2.500000e-01 : f32
    %225 = vector.broadcast %cst_102 : f32 to vector<2x128xf32>
    %226 = arith.mulf %218, %225 : vector<2x128xf32>
    %227 = arith.subf %226, %66 : vector<2x128xf32>
    %228 = arith.subf %214, %227 : vector<2x128xf32>
    %229 = math.absf %228 : vector<2x128xf32>
    %230 = arith.addf %180, %224 : vector<2x128xf32>
    %231 = arith.addf %181, %229 : vector<2x128xf32>
    %232 = arith.addf %66, %214 : vector<2x128xf32>
    %cst_103 = arith.constant 4.000000e+00 : f32
    %233 = vector.broadcast %cst_103 : f32 to vector<2x128xf32>
    %234 = arith.mulf %232, %233 : vector<2x128xf32>
    %235 = arith.subf %234, %216 : vector<2x128xf32>
    %236 = arith.addf %234, %216 : vector<2x128xf32>
    %cst_104 = arith.constant 5.000000e-01 : f32
    %237 = vector.broadcast %cst_104 : f32 to vector<2x128xf32>
    %238 = arith.mulf %220, %237 : vector<2x128xf32>
    %239 = arith.subf %218, %238 : vector<2x128xf32>
    %cst_105 = arith.constant 5.000000e-01 : f32
    %240 = vector.broadcast %cst_105 : f32 to vector<2x128xf32>
    %241 = arith.mulf %220, %240 : vector<2x128xf32>
    %242 = arith.addf %218, %241 : vector<2x128xf32>
    %243 = arith.minimumf %236, %242 : vector<2x128xf32>
    %244 = arith.maximumf %235, %239 : vector<2x128xf32>
    %245 = arith.subf %243, %244 : vector<2x128xf32>
    %cst_106 = arith.constant 0.000000e+00 : f32
    %246 = vector.broadcast %cst_106 : f32 to vector<2x128xf32>
    %247 = arith.maximumf %245, %246 : vector<2x128xf32>
    %248 = arith.subf %236, %235 : vector<2x128xf32>
    %249 = arith.subf %242, %239 : vector<2x128xf32>
    %250 = arith.maximumf %236, %242 : vector<2x128xf32>
    %251 = arith.minimumf %235, %239 : vector<2x128xf32>
    %252 = arith.subf %250, %251 : vector<2x128xf32>
    %253 = arith.addf %239, %242 : vector<2x128xf32>
    %254 = arith.subf %253, %235 : vector<2x128xf32>
    %255 = arith.subf %254, %236 : vector<2x128xf32>
    %256 = arith.mulf %206, %247 : vector<2x128xf32>
    %257 = arith.mulf %207, %248 : vector<2x128xf32>
    %258 = arith.mulf %208, %249 : vector<2x128xf32>
    %259 = arith.mulf %252, %252 : vector<2x128xf32>
    %260 = arith.addf %210, %259 : vector<2x128xf32>
    %261 = arith.mulf %255, %255 : vector<2x128xf32>
    %262 = arith.addf %212, %261 : vector<2x128xf32>
    %cst_107 = arith.constant 1.000000e-07 : f32
    %263 = vector.broadcast %cst_107 : f32 to vector<2x128xf32>
    %264 = arith.addf %256, %263 : vector<2x128xf32>
    %265 = arith.addf %257, %258 : vector<2x128xf32>
    %266 = arith.subf %265, %264 : vector<2x128xf32>
    %267 = tpu.reciprocal %266 {approx = true} : vector<2x128xf32> -> vector<2x128xf32>
    %268 = arith.mulf %264, %267 : vector<2x128xf32>
    %cst_108 = arith.constant 2.500000e-01 : f32
    %269 = vector.broadcast %cst_108 : f32 to vector<2x128xf32>
    %270 = arith.mulf %262, %269 : vector<2x128xf32>
    %cst_109 = arith.constant 1.000000e-07 : f32
    %271 = vector.broadcast %cst_109 : f32 to vector<2x128xf32>
    %272 = arith.addf %260, %271 : vector<2x128xf32>
    %273 = tpu.reciprocal %272 {approx = true} : vector<2x128xf32> -> vector<2x128xf32>
    %274 = arith.mulf %270, %273 : vector<2x128xf32>
    %275 = arith.subf %268, %274 : vector<2x128xf32>
    %276 = arith.andi %86, %68 : vector<2x128xi1>
    %cst_110 = arith.constant 0.000000e+00 : f32
    %277 = vector.broadcast %cst_110 : f32 to vector<2x128xf32>
    %278 = arith.select %276, %230, %277 : vector<2x128xi1>, vector<2x128xf32>
    %cst_111 = arith.constant dense<0.000000e+00> : vector<128xf32>
    %279 = vector.multi_reduction <add>, %278, %cst_111 [0] : vector<2x128xf32> to vector<128xf32>
    %280 = vector.shape_cast %279 : vector<128xf32> to vector<1x128xf32>
    %281 = arith.addf %9, %280 : vector<1x128xf32>
    %cst_112 = arith.constant 0.000000e+00 : f32
    %282 = vector.broadcast %cst_112 : f32 to vector<2x128xf32>
    %283 = arith.select %276, %231, %282 : vector<2x128xi1>, vector<2x128xf32>
    %cst_113 = arith.constant dense<0.000000e+00> : vector<128xf32>
    %284 = vector.multi_reduction <add>, %283, %cst_113 [0] : vector<2x128xf32> to vector<128xf32>
    %285 = vector.shape_cast %284 : vector<128xf32> to vector<1x128xf32>
    %286 = arith.addf %9, %285 : vector<1x128xf32>
    %cst_114 = arith.constant 0.000000e+00 : f32
    %287 = vector.broadcast %cst_114 : f32 to vector<2x128xf32>
    %288 = arith.select %276, %275, %287 : vector<2x128xi1>, vector<2x128xf32>
    %cst_115 = arith.constant dense<0.000000e+00> : vector<128xf32>
    %289 = vector.multi_reduction <add>, %288, %cst_115 [0] : vector<2x128xf32> to vector<128xf32>
    %290 = vector.shape_cast %289 : vector<128xf32> to vector<1x128xf32>
    %291 = arith.addf %9, %290 : vector<1x128xf32>
    %cst_116 = arith.constant 0.000000e+00 : f32
    %292 = vector.broadcast %cst_116 : f32 to vector<2x128xf32>
    %293 = arith.select %276, %116, %292 : vector<2x128xi1>, vector<2x128xf32>
    %cst_117 = arith.constant dense<0.000000e+00> : vector<128xf32>
    %294 = vector.multi_reduction <add>, %293, %cst_117 [0] : vector<2x128xf32> to vector<128xf32>
    %295 = vector.shape_cast %294 : vector<128xf32> to vector<1x128xf32>
    %296 = arith.addf %9, %295 : vector<1x128xf32>
    %c0_118 = arith.constant 0 : index
    %c0_119 = arith.constant 0 : index
    %c0_120 = arith.constant 0 : index
    %c0_121 = arith.constant 0 : index
    %297 = vector.load %arg11[%c0_118, %c0_119, %c0_120, %c0_121] : memref<1x1x4x128xf32, #tpu.memory_space<vmem>>, vector<1x1x1x128xf32>
    %298 = vector.shape_cast %297 : vector<1x1x1x128xf32> to vector<1x128xf32>
    %299 = arith.addf %298, %281 : vector<1x128xf32>
    %c0_122 = arith.constant 0 : index
    %c0_123 = arith.constant 0 : index
    %c0_124 = arith.constant 0 : index
    %c0_125 = arith.constant 0 : index
    %300 = vector.load %arg11[%c0_122, %c0_123, %c0_124, %c0_125] : memref<1x1x4x128xf32, #tpu.memory_space<vmem>>, vector<1x1x1x128xf32>
    %301 = vector.shape_cast %300 : vector<1x1x1x128xf32> to vector<1x128xf32>
    %302 = vector.shape_cast %299 : vector<1x128xf32> to vector<1x1x1x128xf32>
    tpu.vector_store %arg11[%c0_122, %c0_123, %c0_124, %c0_125], %302 {strides = array<i32>} : memref<1x1x4x128xf32, #tpu.memory_space<vmem>>, vector<1x1x1x128xf32>,
    %c0_126 = arith.constant 0 : index
    %c0_127 = arith.constant 0 : index
    %c1_128 = arith.constant 1 : index
    %c0_129 = arith.constant 0 : index
    %303 = vector.load %arg11[%c0_126, %c0_127, %c1_128, %c0_129] : memref<1x1x4x128xf32, #tpu.memory_space<vmem>>, vector<1x1x1x128xf32>
    %304 = vector.shape_cast %303 : vector<1x1x1x128xf32> to vector<1x128xf32>
    %305 = arith.addf %304, %286 : vector<1x128xf32>
    %c0_130 = arith.constant 0 : index
    %c0_131 = arith.constant 0 : index
    %c1_132 = arith.constant 1 : index
    %c0_133 = arith.constant 0 : index
    %306 = vector.load %arg11[%c0_130, %c0_131, %c1_132, %c0_133] : memref<1x1x4x128xf32, #tpu.memory_space<vmem>>, vector<1x1x1x128xf32>
    %307 = vector.shape_cast %306 : vector<1x1x1x128xf32> to vector<1x128xf32>
    %308 = vector.shape_cast %305 : vector<1x128xf32> to vector<1x1x1x128xf32>
    tpu.vector_store %arg11[%c0_130, %c0_131, %c1_132, %c0_133], %308 {strides = array<i32>} : memref<1x1x4x128xf32, #tpu.memory_space<vmem>>, vector<1x1x1x128xf32>,
    %c0_134 = arith.constant 0 : index
    %c0_135 = arith.constant 0 : index
    %c2_136 = arith.constant 2 : index
    %c0_137 = arith.constant 0 : index
    %309 = vector.load %arg11[%c0_134, %c0_135, %c2_136, %c0_137] : memref<1x1x4x128xf32, #tpu.memory_space<vmem>>, vector<1x1x1x128xf32>
    %310 = vector.shape_cast %309 : vector<1x1x1x128xf32> to vector<1x128xf32>
    %311 = arith.addf %310, %291 : vector<1x128xf32>
    %c0_138 = arith.constant 0 : index
    %c0_139 = arith.constant 0 : index
    %c2_140 = arith.constant 2 : index
    %c0_141 = arith.constant 0 : index
    %312 = vector.load %arg11[%c0_138, %c0_139, %c2_140, %c0_141] : memref<1x1x4x128xf32, #tpu.memory_space<vmem>>, vector<1x1x1x128xf32>
    %313 = vector.shape_cast %312 : vector<1x1x1x128xf32> to vector<1x128xf32>
    %314 = vector.shape_cast %311 : vector<1x128xf32> to vector<1x1x1x128xf32>
    tpu.vector_store %arg11[%c0_138, %c0_139, %c2_140, %c0_141], %314 {strides = array<i32>} : memref<1x1x4x128xf32, #tpu.memory_space<vmem>>, vector<1x1x1x128xf32>,
    %c0_142 = arith.constant 0 : index
    %c0_143 = arith.constant 0 : index
    %c3_144 = arith.constant 3 : index
    %c0_145 = arith.constant 0 : index
    %315 = vector.load %arg11[%c0_142, %c0_143, %c3_144, %c0_145] : memref<1x1x4x128xf32, #tpu.memory_space<vmem>>, vector<1x1x1x128xf32>
    %316 = vector.shape_cast %315 : vector<1x1x1x128xf32> to vector<1x128xf32>
    %317 = arith.addf %316, %296 : vector<1x128xf32>
    %c0_146 = arith.constant 0 : index
    %c0_147 = arith.constant 0 : index
    %c3_148 = arith.constant 3 : index
    %c0_149 = arith.constant 0 : index
    %318 = vector.load %arg11[%c0_146, %c0_147, %c3_148, %c0_149] : memref<1x1x4x128xf32, #tpu.memory_space<vmem>>, vector<1x1x1x128xf32>
    %319 = vector.shape_cast %318 : vector<1x1x1x128xf32> to vector<1x128xf32>
    %320 = vector.shape_cast %317 : vector<1x128xf32> to vector<1x1x1x128xf32>
    tpu.vector_store %arg11[%c0_146, %c0_147, %c3_148, %c0_149], %320 {strides = array<i32>} : memref<1x1x4x128xf32, #tpu.memory_space<vmem>>, vector<1x1x1x128xf32>,
    return
  }
  func.func @transform_0(%arg0: i32, %arg1: i32, %arg2: i32, %arg3: memref<2xi32, #tpu.memory_space<smem>>) -> (i32, i32, i32) {
    %c1_i32 = arith.constant 1 : i32
    %0 = arith.muli %arg1, %c1_i32 : i32
    %1 = arith.addi %0, %arg2 : i32
    %c0_i32 = arith.constant 0 : i32
    %c0_i32_0 = arith.constant 0 : i32
    return %arg0, %1, %c0_i32 : i32, i32, i32
  }
  func.func @transform_1(%arg0: i32, %arg1: i32, %arg2: i32, %arg3: memref<2xi32, #tpu.memory_space<smem>>) -> (i32, i32, i32) {
    %c1_i32 = arith.constant 1 : i32
    %0 = arith.muli %arg1, %c1_i32 : i32
    %1 = arith.addi %0, %arg2 : i32
    %c0_i32 = arith.constant 0 : i32
    %c0_i32_0 = arith.constant 0 : i32
    return %arg0, %1, %c0_i32 : i32, i32, i32
  }
  func.func @transform_2(%arg0: i32, %arg1: i32, %arg2: i32, %arg3: memref<2xi32, #tpu.memory_space<smem>>) -> (i32, i32, i32) {
    %c1_i32 = arith.constant 1 : i32
    %0 = arith.muli %arg1, %c1_i32 : i32
    %1 = arith.addi %0, %arg2 : i32
    %c0_i32 = arith.constant 0 : i32
    %c0_i32_0 = arith.constant 0 : i32
    return %arg0, %1, %c0_i32 : i32, i32, i32
  }
  func.func @transform_3(%arg0: i32, %arg1: i32, %arg2: i32, %arg3: memref<2xi32, #tpu.memory_space<smem>>) -> (i32, i32, i32, i32) {
    %c1_i32 = arith.constant 1 : i32
    %0 = arith.muli %arg1, %c1_i32 : i32
    %1 = arith.addi %0, %arg2 : i32
    %c0_i32 = arith.constant 0 : i32
    %c0_i32_0 = arith.constant 0 : i32
    %c0_i32_1 = arith.constant 0 : i32
    return %arg0, %c0_i32, %1, %c0_i32_0 : i32, i32, i32, i32
  }
  func.func @transform_4(%arg0: i32, %arg1: i32, %arg2: i32, %arg3: memref<2xi32, #tpu.memory_space<smem>>) -> (i32, i32, i32, i32) {
    %c1_i32 = arith.constant 1 : i32
    %0 = arith.muli %arg1, %c1_i32 : i32
    %1 = arith.addi %0, %arg2 : i32
    %c0_i32 = arith.constant 0 : i32
    %c0_i32_0 = arith.constant 0 : i32
    %c0_i32_1 = arith.constant 0 : i32
    return %arg0, %c0_i32, %1, %c0_i32_0 : i32, i32, i32, i32
  }
  func.func @transform_5(%arg0: i32, %arg1: i32, %arg2: i32, %arg3: memref<2xi32, #tpu.memory_space<smem>>) -> (i32, i32, i32, i32) {
    %c1_i32 = arith.constant 1 : i32
    %0 = arith.muli %arg1, %c1_i32 : i32
    %1 = arith.addi %0, %arg2 : i32
    %c0_i32 = arith.constant 0 : i32
    %c0_i32_0 = arith.constant 0 : i32
    %c0_i32_1 = arith.constant 0 : i32
    return %arg0, %c0_i32, %1, %c0_i32_0 : i32, i32, i32, i32
  }
  func.func @transform_6(%arg0: i32, %arg1: i32, %arg2: i32, %arg3: memref<2xi32, #tpu.memory_space<smem>>) -> (i32, i32, i32) {
    %c1_i32 = arith.constant 1 : i32
    %0 = arith.muli %arg1, %c1_i32 : i32
    %1 = arith.addi %0, %arg2 : i32
    %c0_i32 = arith.constant 0 : i32
    %c0_i32_0 = arith.constant 0 : i32
    return %arg0, %1, %c0_i32 : i32, i32, i32
  }
  func.func @transform_7(%arg0: i32, %arg1: i32, %arg2: i32, %arg3: memref<2xi32, #tpu.memory_space<smem>>) -> (i32, i32, i32, i32) {
    %c0_i32 = arith.constant 0 : i32
    %c0_i32_0 = arith.constant 0 : i32
    %c0_i32_1 = arith.constant 0 : i32
    return %arg0, %arg1, %c0_i32, %c0_i32_0 : i32, i32, i32, i32
  }
}

</mosaic_0001>

<bundles_post_ra>
// kernel: _lambda_.2
= control target key start
LH: loop header
LB: loop body
LE: loop exit
PB: predicated region body
PF: predicated region fallthrough
CT: control target
= control target key end

     0   :  { %s977_s0 = inlined_call_operand.vmem [shape: f32[2,48], index: 0, kind: input, shape index: {}]   ;;  %s978_s1 = inlined_call_operand.vmem [shape: f32[2,8,2,128], index: 1, kind: output, shape index: {}]  }
   0x1   :  { %981 = sst [smem:[#allocation8_spill]] %s977_s0 }
   0x2   :  { %982 = sst [smem:[#allocation9_spill]] %s978_s1 }
   0x3   :  { %6 = vsyncpa [#allocation3], 0  ;;  %s619_s6 = smov 0   ;;  %s621_s7 = smov 0  }
   0x4   :  { %s623_s8 = smov 0  }
   0x5 LB: > { %983 = sst [smem:[#allocation5_spill]] %s602_s7  ;;  %s509_s9 = sadd.s32 4294967295, %s606_s8   ;;  %s606_s8 = sphi %s623_s8, %s12_s8   ;;  %s602_s7 = sphi %s621_s7, %s992_s7   ;;  %s598_s6 = sphi %s619_s6, %s991_s6  }
   0x6   : > { %984 = sst [smem:[#allocation6_spill]] %s606_s8  ;;  %s24_s10 = sadd.s32 1, %s602_s7 }
   0x7   : > { %p26_p0 = scmp.ge.s32.totalorder %s24_s10, 2  ;;  %p511_p1 = scmp.ge.s32.totalorder %s606_s8, 1 }
   0x8   : > { %p78_p2 = scmp.lt.s32.totalorder %s606_s8, 3  ;;  %p644_p4 = scmp.eq.s32.totalorder %s509_s9, 0 }
   0x9   : > { %s994_s10 = smov (%p26_p0, %s24_s10), 0  ;;  %s988_s0 = sld [smem:[#allocation8_spill]] }
   0xa   : > { %985 = sst [smem:[#allocation7_spill]] %s994_s10  ;;  %p640_p3 = pnand %p511_p1, %p78_p2 }
   0xc   : > { %p534_p5 = pneg %p640_p3 }
   0xe   : > { %p535_p6 = pnand %p644_p4, %p534_p5 }
   0xf   : > { %s91_s15 = sshll.u32 %s988_s0, 4  ;;  %s92_s15 = int_to_ptr.vmem [resolvable:$true] %s91_s15 }
  0x10   : > { %s565_s16 = scalar_lea.vmem %s92_s15, 32  ;;  %p567_p8 = pneg %p535_p6 }
  0x11   : > { %p566_p7 = scmp.ne.s32.totalorder %s92_s15, %s565_s16  ;;  %p573_p11 = scmp.lt.s32.totalorder %s92_s15, %s92_s15 }
  0x12   : > { %p574_p12 = scmp.lt.s32.totalorder %s565_s16, %s565_s16 }
  0x13   : > { %p568_p9 = pnand %p567_p8, %p566_p7 }
  0x14   : > { %p575_p13 = por %p574_p12, %p573_p11 }
  0x15   : > { %p569_p10 = pneg %p568_p9 }
  0x17   : > { %p576_p0 = pnand %p575_p13, %p569_p10 }
  0x19   : > { %579 = shalt.err (!%p576_p0)
}
  0x1a   : > { %s608_s17 = smov [#allocation2]   ;;  %104 = sbr.rel (%p640_p3) target bundleno = 110 (0x6e), region = 24 }
  0x1b   : > { %537 = dma.vmem_to_smem (!%p535_p6), %s92_s15, 32, %s608_s17, [#allocation3]  }
  0x1f   : > { %593 = dma.done.wait (%p644_p4), [#allocation3], 32  }
  0x20   : > { %595 = vsyncadd (%p644_p4), [#allocation3], 4294967264 }
  0x21   : > { %110 = sfence }
  0x22   : > { %s662_s18 = sshll.u32 %s598_s6, 7  ;;  %v228_v0 = vlaneseq  ;;  %p123_p1 = scmp.lt.s32.totalorder %s598_s6, 1 }
  0x23   : > { %s134_s19 = sadd.s32 1, %s662_s18  ;;  %s666_s20 = sld [smem:[#allocation2 + %s662_s18]] }
  0x24   : > { %v229_v1 = vshrl.u32 %v228_v0, 7  ;;  %v232_v2 = vand.u32 127, %v228_v0  ;;  %s136_s21 = sadd.s32 2, %s662_s18  ;;  %s670_s22 = sld [smem:[#allocation2 + %s134_s19]] }
  0x25   : > { %s672_s23 = sld [smem:[#allocation2 + %s136_s21]]  ;;  %s138_s24 = sadd.s32 3, %s662_s18 }
  0x26   : > { %v230_v3 = vcvt.s32.f32 %v229_v1  ;;  %v233_v4 = vcvt.s32.f32 %v232_v2  ;;  %s675_s25 = sld [smem:[#allocation2 + %s138_s24]]  ;;  %s140_s26 = sadd.s32 4, %s662_s18 }
  0x27   : > { %s678_s27 = sld [smem:[#allocation2 + %s140_s26]]  ;;  %s142_s28 = sadd.s32 5, %s662_s18 }
  0x28   : > { %v235_v5 = vmul.f32 128.0, %v230_v3  ;;  %s681_s29 = sld [smem:[#allocation2 + %s142_s28]]  ;;  %s144_s30 = sadd.s32 6, %s662_s18 }
  0x29   : > { %s686_s2 = sld [smem:[#allocation2 + %s144_s30]]  ;;  %s146_s3 = sadd.s32 7, %s662_s18  ;;  %v264_v16 = vstv %s666_s20 }
  0x2a   : > { %v683_v6 = vadd.f32 %v235_v5, %v233_v4  ;;  %s690_s4 = sld [smem:[#allocation2 + %s146_s3]]  ;;  %s148_s5 = sadd.s32 8, %s662_s18  ;;  %v269_v22 = vstv %s670_s22 }
  0x2b   : > { %s693_s9 = sld [smem:[#allocation2 + %s148_s5]]  ;;  %s150_s11 = sadd.s32 9, %s662_s18  ;;  %v275_v25 = vstv %s672_s23 }
  0x2c   : > { %v239_v7 = vmul.f32 0.015625, %v683_v6  ;;  %s696_s12 = sld [smem:[#allocation2 + %s150_s11]]  ;;  %s152_s13 = sadd.s32 10, %s662_s18  ;;  %v266_v24 = vstv %s675_s25  ;;  %vm263_vm4 = vcmp.lt.f32.partialorder %v683_v6, 256.0 }
  0x2d   : > { %s699_s14 = sld [smem:[#allocation2 + %s152_s13]]  ;;  %s154_s15 = sadd.s32 11, %s662_s18  ;;  %v271_v29 = vstv %s678_s27 }
  0x2e   : > { %v240_v8 = vfloor.f32 %v239_v7  ;;  %s702_s16 = sld [smem:[#allocation2 + %s154_s15]]  ;;  %s156_s17 = sadd.s32 12, %s662_s18  ;;  %v277_v32 = vstv %s681_s29 }
  0x2f   : > { %s705_s19 = sld [smem:[#allocation2 + %s156_s17]]  ;;  %s158_s21 = sadd.s32 13, %s662_s18  ;;  %v284_v18 = vstv %s686_s2 }
  0x30   : > { %v241_v9 = vmul.f32 64.0, %v240_v8  ;;  %v518_v10 = vadd.f32 -1.0, %v240_v8  ;;  %s709_s24 = sld [smem:[#allocation2 + %s158_s21]]  ;;  %s160_s26 = sadd.s32 14, %s662_s18  ;;  %v289_v33 = vstv %s690_s4 }
  0x31   : > { %s712_s28 = sld [smem:[#allocation2 + %s160_s26]]  ;;  %s162_s30 = sadd.s32 15, %s662_s18  ;;  %v295_v34 = vstv %s693_s9 }
  0x32   : > { %vm242_vm0 = vcmp.gt.f32.partialorder %v241_v9, %v683_v6  ;;  %s715_s3 = sld [smem:[#allocation2 + %s162_s30]]  ;;  %s164_s5 = sadd.s32 16, %s662_s18  ;;  %v286_v30 = vstv %s696_s12 }
  0x33   : > { %v244_v11 = vsel %vm242_vm0, %v518_v10, %v240_v8  ;;  %s718_s11 = sld [smem:[#allocation2 + %s164_s5]]  ;;  %s166_s13 = sadd.s32 17, %s662_s18  ;;  %v291_v41 = vstv %s699_s14 }
  0x34   : > { %v245_v12 = vadd.f32 1.0, %v244_v11  ;;  %s721_s15 = sld [smem:[#allocation2 + %s166_s13]]  ;;  %s168_s17 = sadd.s32 18, %s662_s18  ;;  %v297_v44 = vstv %s702_s16 }
  0x35   : > { %s724_s21 = sld [smem:[#allocation2 + %s168_s17]]  ;;  %s170_s26 = sadd.s32 19, %s662_s18  ;;  %v305_v19 = vstv %s705_s19 }
  0x36   : > { %v246_v13 = vmul.f32 64.0, %v245_v12  ;;  %s728_s30 = sld [smem:[#allocation2 + %s170_s26]]  ;;  %s172_s0 = sadd.s32 20, %s662_s18  ;;  %v310_v45 = vstv %s709_s24 }
  0x37   : > { %s733_s5 = sld [smem:[#allocation2 + %s172_s0]]  ;;  %s174_s10 = sadd.s32 21, %s662_s18  ;;  %v316_v49 = vstv %s712_s28 }
  0x38   : > { %vm247_vm1 = vcmp.le.f32.partialorder %v246_v13, %v683_v6  ;;  %s737_s13 = sld [smem:[#allocation2 + %s174_s10]]  ;;  %s176_s17 = sadd.s32 22, %s662_s18  ;;  %v307_v31 = vstv %s715_s3 }
  0x39   : > { %v731_v14 = vsel %vm247_vm1, %v245_v12, %v244_v11  ;;  %s741_s7 = sld [smem:[#allocation2 + %s176_s17]]  ;;  %s178_s26 = sadd.s32 23, %s662_s18  ;;  %v312_v48 = vstv %s718_s11 }
  0x3a   : > { %v249_v15 = vmul.f32 64.0, %v731_v14  ;;  %s749_s0 = sld [smem:[#allocation2 + %s178_s26]]  ;;  %s180_s8 = sadd.s32 24, %s662_s18  ;;  %v265_v21 = vsub.f32 %v264_v16, %v731_v14  ;;  %v285_v26 = vsub.f32 %v284_v18, %v731_v14  ;;  %v306_v27 = vsub.f32 %v305_v19, %v731_v14 }
  0x3b   : > { %s752_s10 = sld [smem:[#allocation2 + %s180_s8]]  ;;  %s182_s1 = sadd.s32 25, %s662_s18  ;;  %v326_v23 = vstv %s724_s21  ;;  %v318_v53 = vstv %s721_s15 }
  0x3c   : > { %v745_v17 = vsub.f32 %v683_v6, %v249_v15  ;;  %s759_s20 = sld [smem:[#allocation2 + %s182_s1]]  ;;  %s184_s2 = sadd.s32 26, %s662_s18  ;;  %v327_v35 = vsub.f32 %v326_v23, %v731_v14  ;;  %v267_v38 = vmul.f32 %v266_v24, %v265_v21  ;;  %v287_v40 = vmul.f32 %v286_v30, %v285_v26 }
  0x3d   : > { %s766_s8 = sld [smem:[#allocation2 + %s184_s2]]  ;;  %s186_s19 = sadd.s32 27, %s662_s18  ;;  %v308_v42 = vmul.f32 %v307_v31, %v306_v27  ;;  %v331_v57 = vstv %s728_s30  ;;  %v337_v61 = vstv %s733_s5 }
  0x3e   : > { %v251_v20 = vmul.f32 0.125, %v745_v17  ;;  %s772_s1 = sld [smem:[#allocation2 + %s186_s19]]  ;;  %s188_s21 = sadd.s32 28, %s662_s18  ;;  %v328_v39 = vstv %s737_s13  ;;  %v803_v52 = vmul.f32 %v267_v38, %v267_v38  ;;  %v288_v55 = vmul.f32 %v287_v40, %v287_v40 }
  0x3f   : > { %s779_s25 = sld [smem:[#allocation2 + %s188_s21]]  ;;  %s190_s17 = sadd.s32 29, %s662_s18  ;;  %v329_v50 = vmul.f32 %v328_v39, %v327_v35  ;;  %v810_v56 = vmul.f32 %v308_v42, %v308_v42  ;;  %v333_v60 = vstv %s741_s7 }
  0x40   : > { %v252_v28 = vfloor.f32 %v251_v20  ;;  %s783_s12 = sld [smem:[#allocation2 + %s190_s17]]  ;;  %s192_s3 = sadd.s32 30, %s662_s18  ;;  %v339_v62 = vstv %s749_s0 }
  0x41   : > { %v347_v43 = vstv %s752_s10  ;;  %s788_s4 = sld [smem:[#allocation2 + %s192_s3]]  ;;  %s194_s26 = sadd.s32 31, %s662_s18  ;;  %v330_v63 = vmul.f32 %v329_v50, %v329_v50 }
  0x42   : > { %v253_v36 = vmul.f32 8.0, %v252_v28  ;;  %v519_v37 = vadd.f32 -1.0, %v252_v28  ;;  %v348_v46 = vsub.f32 %v347_v43, %v731_v14  ;;  %s795_s13 = sld [smem:[#allocation2 + %s194_s26]]  ;;  %s196_s2 = sadd.s32 32, %s662_s18  ;;  %v352_v0 = vstv %s759_s20 }
  0x43   : > { %s800_s14 = sld [smem:[#allocation2 + %s196_s2]]  ;;  %s198_s10 = sadd.s32 33, %s662_s18  ;;  %v358_v1 = vstv %s766_s8 }
  0x44   : > { %vm254_vm2 = vcmp.gt.f32.partialorder %v253_v36, %v745_v17  ;;  %v349_v54 = vstv %s772_s1  ;;  %s807_s24 = sld [smem:[#allocation2 + %s198_s10]]  ;;  %s200_s11 = sadd.s32 34, %s662_s18 }
  0x45   : > { %v256_v47 = vsel %vm254_vm2, %v519_v37, %v252_v28  ;;  %v350_v58 = vmul.f32 %v349_v54, %v348_v46  ;;  %s813_s19 = sld [smem:[#allocation2 + %s200_s11]]  ;;  %s996_s6 = smov (!%p123_p1, %s598_s6), 1  ;;  %v354_v3 = vstv %s779_s25 }
  0x46   : > { %v257_v51 = vadd.f32 1.0, %v256_v47  ;;  %v360_v4 = vstv %s783_s12  ;;  %s202_s7 = sadd.s32 35, %s662_s18  ;;  %s204_s30 = sadd.s32 36, %s662_s18 }
  0x47   : > { %v368_v2 = vstv %s788_s4  ;;  %v832_v8 = vmul.f32 %v350_v58, %v350_v58  ;;  %s529_s5 = sshll.u32 %s996_s6, 4  ;;  %s206_s0 = sadd.s32 37, %s662_s18 }
  0x48   : > { %v258_v59 = vmul.f32 8.0, %v257_v51  ;;  %v373_v5 = vstv %s795_s13  ;;  %v369_v9 = vsub.f32 %v368_v2, %v731_v14  ;;  %s855_s22 = sld [smem:[#allocation2 + %s202_s7]]  ;;  %s208_s20 = sadd.s32 38, %s662_s18 }
  0x49   : > { %v379_v10 = vstv %s800_s14  ;;  %s860_s8 = sld [smem:[#allocation2 + %s204_s30]]  ;;  %s210_s27 = sadd.s32 39, %s662_s18 }
  0x4a   : > { %vm259_vm3 = vcmp.le.f32.partialorder %v258_v59, %v745_v17  ;;  %v370_v19 = vstv %s807_s24  ;;  %s869_s1 = sld [smem:[#allocation2 + %s206_s0]]  ;;  %s212_s21 = sadd.s32 40, %s662_s18 }
  0x4b   : > { %v830_v7 = vsel %vm259_vm3, %v257_v51, %v256_v47  ;;  %v371_v28 = vmul.f32 %v370_v19, %v369_v9  ;;  %v375_v30 = vstv %s813_s19  ;;  %s876_s25 = sld [smem:[#allocation2 + %s208_s20]]  ;;  %s214_s23 = sadd.s32 41, %s662_s18 }
  0x4c   : > { %v261_v11 = vmul.f32 8.0, %v830_v7  ;;  %v270_v12 = vsub.f32 %v269_v22, %v830_v7  ;;  %v290_v13 = vsub.f32 %v289_v33, %v830_v7  ;;  %v311_v15 = vsub.f32 %v310_v45, %v830_v7  ;;  %s884_s9 = sld [smem:[#allocation2 + %s210_s27]]  ;;  %s216_s17 = sadd.s32 42, %s662_s18 }
  0x4d   : > { %v332_v16 = vsub.f32 %v331_v57, %v830_v7  ;;  %v353_v18 = vsub.f32 %v352_v0, %v830_v7  ;;  %v374_v20 = vsub.f32 %v373_v5, %v830_v7  ;;  %s890_s28 = sld [smem:[#allocation2 + %s212_s21]]  ;;  %s218_s3 = sadd.s32 43, %s662_s18  ;;  %v372_v50 = vmul.f32 %v371_v28, %v371_v28 }
  0x4e   : > { %v851_v21 = vsub.f32 %v745_v17, %v261_v11  ;;  %v272_v22 = vmul.f32 %v271_v29, %v270_v12  ;;  %v292_v23 = vmul.f32 %v291_v41, %v290_v13  ;;  %v313_v24 = vmul.f32 %v312_v48, %v311_v15  ;;  %s894_s29 = sld [smem:[#allocation2 + %s214_s23]]  ;;  %s222_s16 = sadd.s32 45, %s662_s18 }
  0x4f   : > { %v334_v26 = vmul.f32 %v333_v60, %v332_v16  ;;  %v355_v27 = vmul.f32 %v354_v3, %v353_v18  ;;  %v376_v51 = vmul.f32 %v375_v30, %v374_v20  ;;  %s897_s15 = sld [smem:[#allocation2 + %s216_s17]]  ;;  %s224_s4 = sadd.s32 46, %s662_s18  ;;  %v389_v9 = vstv %s860_s8 }
  0x50   : > { %v273_v17 = vmul.f32 %v272_v22, %v272_v22  ;;  %v276_v29 = vsub.f32 %v275_v25, %v851_v21  ;;  %v293_v31 = vmul.f32 %v292_v23, %v292_v23  ;;  %v296_v33 = vsub.f32 %v295_v34, %v851_v21  ;;  %s903_s26 = sld [smem:[#allocation2 + %s218_s3]]  ;;  %s220_s13 = sadd.s32 44, %s662_s18 }
  0x51   : > { %v314_v35 = vmul.f32 %v313_v24, %v313_v24  ;;  %v317_v36 = vsub.f32 %v316_v49, %v851_v21  ;;  %v335_v37 = vmul.f32 %v334_v26, %v334_v26  ;;  %v338_v38 = vsub.f32 %v337_v61, %v851_v21  ;;  %s909_s2 = sld [smem:[#allocation2 + %s222_s16]]  ;;  %s226_s10 = sadd.s32 47, %s662_s18 }
  0x52   : > { %v274_v25 = vadd.f32 %v273_v17, %v803_v52  ;;  %v278_v39 = vmul.f32 %v277_v32, %v276_v29  ;;  %v294_v34 = vadd.f32 %v293_v31, %v288_v55  ;;  %v298_v40 = vmul.f32 %v297_v44, %v296_v33  ;;  %s989_s19 = sld [smem:[#allocation9_spill]] }
  0x53   : > { %v315_v41 = vadd.f32 %v314_v35, %v810_v56  ;;  %v319_v42 = vmul.f32 %v318_v53, %v317_v36  ;;  %v336_v43 = vadd.f32 %v335_v37, %v330_v63  ;;  %v340_v45 = vmul.f32 %v339_v62, %v338_v38  ;;  %s920_s12 = sld [smem:[#allocation2 + %s224_s4]] }
  0x54   : > { %v279_v46 = vmul.f32 %v278_v39, %v278_v39  ;;  %v299_v32 = vmul.f32 %v298_v40, %v298_v40  ;;  %v356_v47 = vmul.f32 %v355_v27, %v355_v27  ;;  %v359_v44 = vsub.f32 %v358_v1, %v851_v21  ;;  %s922_s6 = sld [smem:[#allocation2 + %s220_s13]] }
  0x55   : > { %v320_v48 = vmul.f32 %v319_v42, %v319_v42  ;;  %v341_v49 = vmul.f32 %v340_v45, %v340_v45  ;;  %v377_v58 = vmul.f32 %v376_v51, %v376_v51  ;;  %v380_v59 = vsub.f32 %v379_v10, %v851_v21  ;;  %s929_s18 = sld [smem:[#allocation2 + %s226_s10]] }
  0x56   : > { %v280_v52 = vadd.f32 %v279_v46, %v274_v25  ;;  %v300_v53 = vadd.f32 %v299_v32, %v294_v34  ;;  %v357_v54 = vadd.f32 %v356_v47, %v832_v8  ;;  %v361_v55 = vmul.f32 %v360_v4, %v359_v44 }
  0x57   : > { %v321_v56 = vadd.f32 %v320_v48, %v315_v41  ;;  %v342_v57 = vadd.f32 %v341_v49, %v336_v43  ;;  %v381_v63 = vstv %s855_s22  ;;  %v378_v2 = vadd.f32 %v377_v58, %v372_v50 }
  0x58   : > { %s917_s7 = scalar_lea.vmem %s989_s19, %s529_s5  ;;  %v281_v60 = vsub.f32 0.0, %v280_v52  ;;  %v301_v61 = vsub.f32 0.0, %v300_v53  ;;  %v362_v62 = vmul.f32 %v361_v55, %v361_v55  ;;  %v382_v3 = vmul.f32 %v381_v63, %v380_v59 }
  0x59   : > { %v322_v0 = vsub.f32 0.0, %v321_v56  ;;  %v343_v1 = vsub.f32 0.0, %v342_v57  ;;  %v390_v13 = vsub.f32 %v389_v9, %v731_v14  ;;  %v391_v16 = vstv %s884_s9 }
  0x5a   : > { %v282_v4 = vsel %vm263_vm4, %v281_v60, -1e+30  ;;  %v302_v5 = vsel %vm263_vm4, %v301_v61, -1e+30  ;;  %v363_v8 = vadd.f32 %v362_v62, %v357_v54  ;;  %v383_v12 = vmul.f32 %v382_v3, %v382_v3 }
  0x5b   : > { %283 = vst [vmem:[%s917_s7] sm:$0x3] %v282_v4  ;;  %520 = vst [vmem:[%s917_s7 + $0x2] sm:$0x3] %v302_v5  ;;  %v323_v10 = vsel %vm263_vm4, %v322_v0, -1e+30  ;;  %v394_v18 = vstv %s869_s1  ;;  %v396_v19 = vstv %s890_s28  ;;  %v392_v22 = vmul.f32 %v391_v16, %v390_v13 }
  0x5c   : > { %v344_v11 = vsel %vm263_vm4, %v343_v1, -1e+30  ;;  %521 = vst [vmem:[%s917_s7 + $0x4] sm:$0x3] %v323_v10  ;;  %v364_v15 = vsub.f32 0.0, %v363_v8  ;;  %v384_v20 = vadd.f32 %v383_v12, %v378_v2  ;;  %v395_v23 = vsub.f32 %v394_v18, %v830_v7 }
  0x5d   : > { %522 = vst [vmem:[%s917_s7 + $0x6] sm:$0x3] %v344_v11  ;;  %v400_v24 = vstv %s876_s25  ;;  %v402_v28 = vstv %s894_s29  ;;  %v410_v30 = vstv %s897_s15  ;;  %v393_v29 = vmul.f32 %v392_v22, %v392_v22 }
  0x5e   : > { %v365_v26 = vsel %vm263_vm4, %v364_v15, -1e+30  ;;  %v401_v27 = vsub.f32 %v400_v24, %v851_v21  ;;  %v385_v17 = vsub.f32 0.0, %v384_v20  ;;  %v397_v31 = vmul.f32 %v396_v19, %v395_v23 }
  0x5f   : > { %523 = vst [vmem:[%s917_s7 + $0x8] sm:$0x3] %v365_v26  ;;  %v411_v33 = vsub.f32 %v410_v30, %v731_v14  ;;  %v412_v36 = vstv %s909_s2  ;;  %v415_v37 = vstv %s903_s26  ;;  %v417_v38 = vstv %s920_s12 }
  0x60   : > { %v403_v35 = vmul.f32 %v402_v28, %v401_v27  ;;  %v386_v25 = vsel %vm263_vm4, %v385_v17, -1e+30  ;;  %v398_v39 = vmul.f32 %v397_v31, %v397_v31  ;;  %v416_v40 = vsub.f32 %v415_v37, %v830_v7 }
  0x61   : > { %v413_v34 = vmul.f32 %v412_v36, %v411_v33  ;;  %524 = vst [vmem:[%s917_s7 + $0xa] sm:$0x3] %v386_v25  ;;  %v421_v42 = vstv %s922_s6  ;;  %v423_v43 = vstv %s929_s18 }
  0x62   : > { %v404_v41 = vmul.f32 %v403_v35, %v403_v35  ;;  %v399_v45 = vadd.f32 %v398_v39, %v393_v29  ;;  %v418_v14 = vmul.f32 %v417_v38, %v416_v40  ;;  %v422_v32 = vsub.f32 %v421_v42, %v851_v21 }
  0x63   : > { %v414_v46 = vmul.f32 %v413_v34, %v413_v34 }
  0x64   : > { %v405_v47 = vadd.f32 %v404_v41, %v399_v45  ;;  %v419_v44 = vmul.f32 %v418_v14, %v418_v14  ;;  %v424_v48 = vmul.f32 %v423_v43, %v422_v32 }
  0x66   : > { %v406_v49 = vsub.f32 0.0, %v405_v47  ;;  %v420_v50 = vadd.f32 %v419_v44, %v414_v46  ;;  %v425_v51 = vmul.f32 %v424_v48, %v424_v48 }
  0x68   : > { %v407_v7 = vsel %vm263_vm4, %v406_v49, -1e+30  ;;  %v426_v52 = vadd.f32 %v425_v51, %v420_v50 }
  0x69   : > { %525 = vst [vmem:[%s917_s7 + $0xc] sm:$0x3] %v407_v7 }
  0x6a   : > { %v427_v53 = vsub.f32 0.0, %v426_v52 }
  0x6c   : > { %v428_v54 = vsel %vm263_vm4, %v427_v53, -1e+30 }
  0x6d   : > { %526 = vst [vmem:[%s917_s7 + $0xe] sm:$0x3] %v428_v54 }
  0x6e PF: > { %s990_s14 = sld [smem:[#allocation6_spill]] }
  0x6f   : > { %s991_s6 = sld [smem:[#allocation5_spill]] }
  0x70   : > { %s992_s7 = sld [smem:[#allocation7_spill]] }
  0x74   : > { %s12_s8 = sadd.s32 1, %s990_s14  }
  0x75   : > { %p9_p2 = scmp.ge.s32.totalorder %s12_s8, 4  }
  0x77   :  { %11 = sbr.rel (!%p9_p2) target bundleno = 5 (0x5), region = 63 }
  0x7c   :  { %458 = vsyncpa [#allocation3], 1 }
  0x7d   :  { %460 = vsyncpa [#allocation3 + $0x1], 1 }

// kernel: _lambda_.3
= control target key start
LH: loop header
LB: loop body
LE: loop exit
PB: predicated region body
PF: predicated region fallthrough
CT: control target
= control target key end

     0   :  { %s1426_s0 = inlined_call_operand.vmem [shape: s32[2], index: 0, kind: input, shape index: {}]   ;;  %s1427_s1 = inlined_call_operand.vmem [shape: f32[2,2,128], index: 1, kind: input, shape index: {}]   ;;  %s1428_s2 = inlined_call_operand.vmem [shape: f32[2,2,128], index: 2, kind: input, shape index: {}]   ;;  %s1429_s3 = inlined_call_operand.vmem [shape: f32[2,2,128], index: 3, kind: input, shape index: {}]   ;;  %s1430_s4 = inlined_call_operand.vmem [shape: f32[2,3,2,128], index: 4, kind: input, shape index: {}]   ;;  %s1431_s5 = inlined_call_operand.vmem [shape: f32[2,3,2,128], index: 5, kind: input, shape index: {}]   ;;  %s1432_s6 = inlined_call_operand.vmem [shape: f32[2,6,2,128], index: 6, kind: input, shape index: {}]   ;;  %s1433_s7 = inlined_call_operand.vmem [shape: f32[2,2,128], index: 7, kind: output, shape index: {0}]   ;;  %s1434_s8 = inlined_call_operand.vmem [shape: f32[2,1,4,128], index: 8, kind: output, shape index: {1}]  }
   0x1   :  { %s14_s29 = sshll.u32 %s1426_s0, 4  ;;  %s15_s29 = int_to_ptr.vmem [resolvable:$true] %s14_s29 }
   0x2   :  { %s1066_s30 = scalar_lea.vmem %s15_s29, 16  ;;  %p1071_p1 = scmp.lt.s32.totalorder %s15_s29, %s15_s29 }
   0x3   :  { %p1067_p0 = scmp.ne.s32.totalorder %s15_s29, %s1066_s30  ;;  %p1072_p2 = scmp.lt.s32.totalorder %s1066_s30, %s1066_s30 }
   0x5   :  { %p1073_p3 = por %p1072_p2, %p1071_p1 }
   0x7   :  { %p1074_p4 = pnand %p1073_p3, %p1067_p0 }
   0x9   :  { %1077 = shalt.err (!%p1074_p4)  }
   0xa   :  { %s1104_s9 = smov [#allocation3]  }
   0xb   :  { %17 = dma.vmem_to_smem %s15_s29, 16, %s1104_s9, [#allocation2] }
   0xc   :  { %1090 = dma.done.wait [#allocation2], 16 }
   0xd   :  { %1091 = vsyncadd [#allocation2], 4294967280 }
   0xe   :  { %19 = sfence }
   0xf   :  { %s1155_s10 = smov 0   ;;  %s1157_s11 = smov 0  }
  0x10   :  { %s1159_s12 = smov 0  }
  0x11 LB: > { %s44_s0 = sadd.s32 1, %s1098_s11  ;;  %p1005_p5 = scmp.ge.s32.totalorder %s1102_s12, 1  ;;  %s1102_s12 = sphi %s1159_s12, %s25_s12   ;;  %s1098_s11 = sphi %s1157_s11, %s1444_s11   ;;  %s1094_s10 = sphi %s1155_s10, %s1443_s10  }
  0x12   : > { %p46_p6 = scmp.ge.s32.totalorder %s44_s0, 2  ;;  %p373_p7 = scmp.lt.s32.totalorder %s1102_s12, 3 }
  0x14   : > { %s1446_s0 = smov (%p46_p6, %s44_s0), 0  ;;  %p374_p8 = pnand %p1005_p5, %p373_p7 }
  0x15   : > { %p462_p9 = scmp.lt.s32.totalorder (!%p374_p8), %s1094_s10, 1  ;;  %s1232_s16 = sld [smem:[#allocation3 + %s1094_s10]] (!%p374_p8) }
  0x16   : > { %377 = sbr.rel (%p374_p8) target bundleno = 128 (0x80), region = 44 }
  0x1b   : > { %v546_v0 = vlaneseq  ;;  %s1177_s13 = scalar_select %p462_p9, %s1094_s10, 1  ;;  %v1105_v5 = vmov 0.0   ;;  %vm747_vm5 = vcmask 1041408   ;;  %v1106_v58 = vmov 0.25  }
  0x1c   : > { %p537_p10 = scmp.gt.s32.totalorder %s1232_s16, 0 }
  0x1d   : > { %v547_v1 = vshrl.u32 %v546_v0, 7  ;;  %v550_v2 = vand.u32 127, %v546_v0  ;;  %s1013_s14 = sshll.u32 %s1177_s13, 2  ;;  %s1181_s15 = sshll.u32 %s1177_s13, 1 }
  0x1e   : > { %s1186_s18 = scalar_lea.vmem %s1434_s8, %s1013_s14  ;;  %s468_s21 = scalar_lea.vmem %s1427_s1, %s1181_s15 }
  0x1f   : > { %v548_v3 = vcvt.s32.f32 %v547_v1  ;;  %v551_v4 = vcvt.s32.f32 %v550_v2  ;;  %542 = vst [vmem:[%s1186_s18] sm:$0xf] %v1105_v5  ;;  %v1193_v6 = vld [vmem:[%s468_s21] sm:$0x3]  ;;  %s1028_s22 = smul.u32 12, %s1177_s13  ;;  %s477_s14 = scalar_lea.vmem %s1428_s2, %s1181_s15 }
  0x20   : > { %v582_v9 = vand.u32 2147483647, %v1193_v6  ;;  %s1027_s23 = smul.u32 6, %s1177_s13  ;;  %v1234_v28 = vld [vmem:[%s477_s14] sm:$0x3]  ;;  %v599_v49 = vmax.f32 %v1193_v6, 0.0  ;;  %s525_s25 = scalar_lea.vmem %s1433_s7, %s1181_s15 }
  0x21   : > { %v553_v7 = vmul.f32 128.0, %v548_v3  ;;  %s1203_s26 = scalar_lea.vmem %s1432_s6, %s1028_s22  ;;  %vm594_vm3 = vcmp.eq.f32.partialorder %v1234_v28, 1.0  ;;  %v600_v50 = vmul.f32 %v1234_v28, %v1193_v6  ;;  %vm589_vm7 = vcmp.ge.f32.partialorder %v1193_v6, 0.0  ;;  %s486_s22 = scalar_lea.vmem %s1429_s3, %s1181_s15 }
  0x22   : > { %v583_v11 = vsub.f32 0.0, %v582_v9  ;;  %s506_s29 = scalar_lea.vmem %s1431_s5, %s1027_s23  ;;  %v1016_v14 = vld [vmem:[%s1203_s26 + $0x6] sm:$0x3]  ;;  %v1020_v20 = vld [vmem:[%s1203_s26 + $0x8] sm:$0x3]  ;;  %s1248_s10 = scalar_lea.vmem %s1430_s4, %s1027_s23  ;;  %v1286_v59 = vsel %vm594_vm3, 0.75, %v1106_v58 }
  0x23   : > { %v1196_v8 = vadd.f32 %v553_v7, %v551_v4  ;;  %v1212_v15 = vmul.f32 0.5, %v1016_v14  ;;  %v1214_v18 = vld [vmem:[%s506_s29] sm:$0x3]  ;;  %v1224_v21 = vmul.f32 0.5, %v1020_v20  ;;  %v1226_v23 = vld [vmem:[%s506_s29 + $0x2] sm:$0x3]  ;;  %v1289_v62 = vsub.f32 %v599_v49, %v600_v50 }
  0x24   : > { %v584_v13 = vmul.f32 1.442695, %v583_v11  ;;  %v1024_v24 = vld [vmem:[%s1203_s26 + $0xa] sm:$0x3]  ;;  %v1238_v32 = vld [vmem:[%s506_s29 + $0x4] sm:$0x3] }
  0x25   : > { %v557_v10 = vmul.f32 0.015625, %v1196_v8  ;;  %v625_v19 = vsub.f32 %v1214_v18, %v1212_v15  ;;  %v660_v27 = vsub.f32 %v1226_v23, %v1224_v21  ;;  %v1236_v29 = vmul.f32 0.5, %v1024_v24  ;;  %v619_v41 = vld [vmem:[%s1248_s10] sm:$0x3]  ;;  %s1279_s13 = scalar_select %p537_p10, 1, 0 }
  0x26   : > { %1056 = vpow2.f32 %v584_v13  ;;  %vm581_vm2 = vcmp.lt.f32.partialorder %v1196_v8, 256.0  ;;  %v621_v53 = vld [vmem:[%s1203_s26] sm:$0x3]  ;;  %v1019_v57 = vld [vmem:[%s1203_s26 + $0x2] sm:$0x3] }
  0x27   : > { %v558_v12 = vfloor.f32 %v557_v10  ;;  %v626_v26 = vand.u32 2147483647, %v625_v19  ;;  %v661_v31 = vand.u32 2147483647, %v660_v27  ;;  %v702_v33 = vsub.f32 %v1238_v32, %v1236_v29  ;;  %vm1259_vm4 = vmand %vm594_vm3, %vm581_vm2  ;;  %v1023_v11 = vld [vmem:[%s1203_s26 + $0x4] sm:$0x3] }
  0x28   : > { %v627_v55 = vmul.f32 0.25, %v621_v53  ;;  %v613_v63 = vstv %s1279_s13  ;;  %v635_v0 = vsub.f32 %v621_v53, %v1212_v15  ;;  %v636_v2 = vadd.f32 %v1212_v15, %v621_v53  ;;  %v1021_v49 = vld [vmem:[%s1248_s10 + $0x4] sm:$0x3] }
  0x29   : > { %v559_v16 = vmul.f32 64.0, %v558_v12  ;;  %v1014_v17 = vadd.f32 -1.0, %v558_v12  ;;  %v666_v34 = vadd.f32 %v661_v31, %v626_v26  ;;  %v703_v36 = vand.u32 2147483647, %v702_v33  ;;  %v1330_v31 = vld [vmem:[%s486_s22] sm:$0x3] }
  0x2a   : > { %v1295_v3 = vsub.f32 %v1019_v57, %v1224_v21  ;;  %v1305_v10 = vadd.f32 %v1019_v57, %v1224_v21  ;;  %v642_v13 = vsub.f32 %v636_v2, %v635_v0  ;;  %v662_v14 = vmul.f32 0.25, %v1019_v57 }
  0x2b   : > { %vm560_vm0 = vcmp.gt.f32.partialorder %v559_v16, %v1196_v8  ;;  %v708_v39 = vadd.f32 %v703_v36, %v666_v34  ;;  %v1312_v16 = vadd.f32 %v636_v2, %v635_v0  ;;  %v704_v20 = vmul.f32 0.25, %v1023_v11 }
  0x2c   : > { %v562_v22 = vsel %vm560_vm0, %v1014_v17, %v558_v12  ;;  %v1017_v17 = vld [vmem:[%s1248_s10 + $0x2] sm:$0x3]  ;;  %v679_v19 = vsub.f32 %v1305_v10, %v1295_v3  ;;  %v1323_v21 = vsub.f32 %v1023_v11, %v1236_v29  ;;  %vm607_vm9 = vcmp.eq.f32.partialorder %v1330_v31, 0.0 }
  0x2d   : > { %v563_v25 = vadd.f32 1.0, %v562_v22  ;;  %v746_v43 = vsel %vm1259_vm4, %v708_v39, 0.0  ;;  %vm1356_vm10 = vcmp.eq.s32.totalorder %v613_v63, 1  ;;  %vm1376_vm12 = vmand %vm607_vm9, %vm581_vm2 }
  0x2e   : > { %v748_v47 = vsel %vm747_vm5, %v746_v43, 0.0 }
  0x2f   : > { %v564_v30 = vmul.f32 64.0, %v563_v25  ;;  %v749_v54 = vrot.slane %v748_v47, 4 }
  0x31   : > { %vm565_vm1 = vcmp.le.f32.partialorder %v564_v30, %v1196_v8  ;;  %v750_v60 = vadd.f32 %v749_v54, %v748_v47 }
  0x32   : > { %v1250_v35 = vsel %vm565_vm1, %v563_v25, %v562_v22  ;;  %v1326_v22 = vadd.f32 %v1023_v11, %v1236_v29 }
  0x33   : > { %v567_v37 = vmul.f32 64.0, %v1250_v35  ;;  %v1267_v42 = vpop.eup %1056  ;;  %v631_v46 = vadd.f32 %v619_v41, %v1250_v35  ;;  %v751_v4 = vrot.slane %v750_v60, 2  ;;  %v628_v5 = vsub.f32 %v627_v55, %v1250_v35 }
  0x34   : > { %v586_v45 = vadd.f32 1.0, %v1267_v42  ;;  %v1343_v53 = vadd.f32 %v1326_v22, %v1323_v21 }
  0x35   : > { %v1264_v40 = vsub.f32 %v1196_v8, %v567_v37  ;;  %v632_v56 = vmul.f32 4.0, %v631_v46  ;;  %v752_v15 = vadd.f32 %v751_v4, %v750_v60  ;;  %v629_v26 = vsub.f32 %v619_v41, %v628_v5  ;;  %v783_v37 = vld [vmem:[%s1186_s18] sm:$0x1] }
  0x36   : > { %1058 = vrcp.f32 %v586_v45  ;;  %v721_v41 = vsub.f32 %v1326_v22, %v1323_v21 }
  0x37   : > { %v569_v44 = vmul.f32 0.125, %v1264_v40  ;;  %1060 = vlog2.f32 %v586_v45  ;;  %v1299_v7 = vsub.f32 %v632_v56, %v1214_v18  ;;  %v1302_v9 = vadd.f32 %v632_v56, %v1214_v18 }
  0x38   : > { %v1319_v18 = vadd.f32 %v1305_v10, %v1295_v3  ;;  %v753_v24 = vrot.slane %v752_v15, 1 }
  0x39   : > { %v570_v48 = vfloor.f32 %v569_v44  ;;  %v637_v27 = vmin.f32 %v1302_v9, %v636_v2  ;;  %v638_v30 = vmax.f32 %v1299_v7, %v635_v0  ;;  %v643_v43 = vmax.f32 %v1302_v9, %v636_v2 }
  0x3a   : > { %v754_v36 = vadd.f32 %v753_v24, %v752_v15  ;;  %v644_v29 = vmin.f32 %v1299_v7, %v635_v0  ;;  %v688_v44 = vmul.f32 %v679_v19, %v642_v13 }
  0x3b   : > { %v571_v51 = vmul.f32 8.0, %v570_v48  ;;  %v1015_v52 = vadd.f32 -1.0, %v570_v48 }
  0x3c   : > { %v784_v54 = vadd.f32 %v783_v37, %v754_v36  ;;  %v645_v58 = vsub.f32 %v643_v43, %v644_v29  ;;  %v730_v29 = vmul.f32 %v721_v41, %v688_v44 }
  0x3d   : > { %vm572_vm6 = vcmp.gt.f32.partialorder %v571_v51, %v1264_v40  ;;  %v630_v51 = vand.u32 2147483647, %v629_v26 }
  0x3e   : > { %v574_v61 = vsel %vm572_vm6, %v1015_v52, %v570_v48  ;;  %v639_v52 = vsub.f32 %v637_v27, %v638_v30  ;;  %785 = vst [vmem:[%s1186_s18] sm:$0x1] %v784_v54  ;;  %v649_v24 = vmul.f32 %v645_v58, %v645_v58 }
  0x3f   : > { %v575_v1 = vadd.f32 1.0, %v574_v61 }
  0x41   : > { %v576_v12 = vmul.f32 8.0, %v575_v1 }
  0x43   : > { %vm577_vm8 = vcmp.le.f32.partialorder %v576_v12, %v1264_v40  ;;  %v1059_v39 = vpop.eup %1058 }
  0x44   : > { %v578_v25 = vsel %vm577_vm8, %v575_v1, %v574_v61  ;;  %v590_v46 = vmul.f32 %v1059_v39, %v1267_v42  ;;  %v1061_v50 = vpop.eup %1060  ;;  %v641_v1 = vsub.f32 %v1302_v9, %v1299_v7 }
  0x45   : > { %v579_v33 = vmul.f32 8.0, %v578_v25  ;;  %v663_v34 = vsub.f32 %v662_v14, %v578_v25  ;;  %v668_v35 = vadd.f32 %v1017_v17, %v578_v25  ;;  %v603_v0 = vmul.f32 0.6931472, %v1061_v50 }
  0x47   : > { %v580_v45 = vsub.f32 %v1264_v40, %v579_v33  ;;  %v664_v47 = vsub.f32 %v1017_v17, %v663_v34  ;;  %v669_v48 = vmul.f32 4.0, %v668_v35  ;;  %v591_v40 = vsel %vm589_vm7, %v1059_v39, %v590_v46 }
  0x48   : > { %v592_v57 = vmax.f32 %v591_v40, 0.0001  ;;  %v604_v26 = vadd.f32 %v603_v0, %v1289_v62  ;;  %v647_v39 = vsub.f32 %v1312_v16, %v1299_v7 }
  0x49   : > { %v665_v55 = vand.u32 2147483647, %v664_v47  ;;  %v670_v42 = vsub.f32 %v669_v48, %v1226_v23  ;;  %v671_v56 = vadd.f32 %v1226_v23, %v669_v48  ;;  %v705_v60 = vsub.f32 %v704_v20, %v580_v45 }
  0x4a   : > { %v710_v61 = vadd.f32 %v1021_v49, %v580_v45  ;;  %v593_v6 = vmin.f32 %v592_v57, 0.9999  ;;  %v640_v20 = vmax.f32 %v639_v52, 0.0 }
  0x4b   : > { %v674_v2 = vmin.f32 %v671_v56, %v1305_v10  ;;  %v675_v4 = vmax.f32 %v670_v42, %v1295_v3  ;;  %v678_v23 = vsub.f32 %v671_v56, %v670_v42  ;;  %v680_v11 = vmax.f32 %v671_v56, %v1305_v10 }
  0x4c   : > { %v681_v12 = vmin.f32 %v670_v42, %v1295_v3  ;;  %v667_v13 = vadd.f32 %v665_v55, %v630_v51  ;;  %v706_v15 = vsub.f32 %v1021_v49, %v705_v60  ;;  %v711_v17 = vmul.f32 4.0, %v710_v61 }
  0x4d   : > { %v676_v14 = vsub.f32 %v674_v2, %v675_v4  ;;  %v596_v19 = vsub.f32 1.0, %v593_v6  ;;  %vm610_vm11 = vcmp.lt.f32.partialorder %v593_v6, 0.8  ;;  %v687_v33 = vmul.f32 %v678_v23, %v641_v1 }
  0x4e   : > { %v682_v25 = vsub.f32 %v680_v11, %v681_v12  ;;  %v707_v27 = vand.u32 2147483647, %v706_v15  ;;  %v712_v63 = vsub.f32 %v711_v17, %v1238_v32  ;;  %v713_v30 = vadd.f32 %v1238_v32, %v711_v17  ;;  %vm1386_vm13 = vmand %vm610_vm11, %vm594_vm3  ;;  %v786_v15 = vld [vmem:[%s1186_s18 + $0x1] sm:$0x1] }
  0x4f   : > { %v597_v10 = vsel %vm594_vm3, %v596_v19, %v593_v6  ;;  %v677_v3 = vmax.f32 %v676_v14, 0.0  ;;  %v684_v46 = vsub.f32 %v1319_v18, %v670_v42  ;;  %vm615_vm14 = vmand %vm1356_vm10, %vm1386_vm13 }
  0x50   : > { %v598_v34 = vmul.f32 %v597_v10, %v597_v10  ;;  %v689_v35 = vmul.f32 %v682_v25, %v682_v25  ;;  %v709_v36 = vadd.f32 %v707_v27, %v667_v13  ;;  %v716_v37 = vmin.f32 %v713_v30, %v1326_v22  ;;  %v792_v27 = vld [vmem:[%s1186_s18 + $0x3] sm:$0x1] }
  0x51   : > { %v717_v62 = vmax.f32 %v712_v63, %v1323_v21  ;;  %v720_v43 = vsub.f32 %v713_v30, %v712_v63  ;;  %v722_v47 = vmax.f32 %v713_v30, %v1326_v22  ;;  %v723_v7 = vmin.f32 %v712_v63, %v1323_v21 }
  0x52   : > { %v605_v32 = vmul.f32 %v598_v34, %v1286_v59  ;;  %v686_v8 = vmul.f32 %v677_v3, %v640_v20  ;;  %v756_v44 = vsel %vm1259_vm4, %v709_v36, 0.0  ;;  %v690_v18 = vadd.f32 %v689_v35, %v649_v24 }
  0x53   : > { %v718_v59 = vsub.f32 %v716_v37, %v717_v62  ;;  %v729_v31 = vmul.f32 %v720_v43, %v687_v33  ;;  %v724_v48 = vsub.f32 %v722_v47, %v723_v7  ;;  %v757_v22 = vsel %vm747_vm5, %v756_v44, 0.0 }
  0x54   : > { %v606_v41 = vmul.f32 %v605_v32, %v604_v26  ;;  %v648_v21 = vsub.f32 %v647_v39, %v1302_v9  ;;  %v758_v49 = vrot.slane %v757_v22, 4  ;;  %v685_v51 = vsub.f32 %v684_v46, %v671_v56  ;;  %v789_v46 = vld [vmem:[%s1186_s18 + $0x2] sm:$0x1] }
  0x55   : > { %v719_v28 = vmax.f32 %v718_v59, 0.0  ;;  %v726_v52 = vsub.f32 %v1343_v53, %v712_v63  ;;  %v731_v54 = vmul.f32 %v724_v48, %v724_v48  ;;  %v736_v55 = vadd.f32 %v730_v29, %v729_v31 }
  0x56   : > { %v609_v50 = vsel %vm1376_vm12, %v606_v41, 0.0  ;;  %v759_v42 = vadd.f32 %v758_v49, %v757_v22  ;;  %v650_v60 = vmul.f32 %v648_v21, %v648_v21  ;;  %v691_v1 = vmul.f32 %v685_v51, %v685_v51 }
  0x57   : > { %v616_v40 = vmul.f32 4.0, %v609_v50  ;;  %v728_v9 = vmul.f32 %v719_v28, %v686_v8  ;;  %v732_v57 = vadd.f32 %v731_v54, %v690_v18  ;;  %v727_v56 = vsub.f32 %v726_v52, %v713_v30 }
  0x58   : > { %v760_v0 = vrot.slane %v759_v42, 2  ;;  %v692_v12 = vadd.f32 %v691_v1, %v650_v60 }
  0x59   : > { %v617_v58 = vsel %vm615_vm14, %v616_v40, %v609_v50  ;;  %v735_v61 = vadd.f32 1e-07, %v728_v9  ;;  %v741_v2 = vadd.f32 1e-07, %v732_v57  ;;  %v733_v13 = vmul.f32 %v727_v56, %v727_v56 }
  0x5a   : > { %618 = vst [vmem:[%s525_s25] sm:$0x3] %v617_v58  ;;  %v774_v53 = vsel %vm1259_vm4, %v617_v58, 0.0  ;;  %v761_v5 = vadd.f32 %v760_v0, %v759_v42 }
  0x5b   : > { %v737_v4 = vsub.f32 %v736_v55, %v735_v61  ;;  %v775_v6 = vsel %vm747_vm5, %v774_v53, 0.0  ;;  %1062 = vrcp.f32 %v741_v2  ;;  %v734_v24 = vadd.f32 %v733_v13, %v692_v12 }
  0x5c   : > { %v776_v23 = vrot.slane %v775_v6, 4  ;;  %v762_v11 = vrot.slane %v761_v5, 1 }
  0x5d   : > { %1064 = vrcp.f32 %v737_v4  ;;  %v740_v63 = vmul.f32 0.25, %v734_v24 }
  0x5e   : > { %v777_v14 = vadd.f32 %v776_v23, %v775_v6  ;;  %v763_v17 = vadd.f32 %v762_v11, %v761_v5 }
  0x60   : > { %v778_v19 = vrot.slane %v777_v14, 2  ;;  %v787_v20 = vadd.f32 %v786_v15, %v763_v17 }
  0x62   : > { %v779_v25 = vadd.f32 %v778_v19, %v777_v14  ;;  %788 = vst [vmem:[%s1186_s18 + $0x1] sm:$0x1] %v787_v20 }
  0x64   : > { %v780_v26 = vrot.slane %v779_v25, 1 }
  0x66   : > { %v781_v30 = vadd.f32 %v780_v26, %v779_v25 }
  0x68   : > { %v793_v10 = vadd.f32 %v792_v27, %v781_v30  ;;  %v1063_v3 = vpop.eup %1062 }
  0x69   : > { %v743_v34 = vmul.f32 %v1063_v3, %v740_v63 }
  0x6a   : > { %v1065_v33 = vpop.eup %1064  ;;  %794 = vst [vmem:[%s1186_s18 + $0x3] sm:$0x1] %v793_v10 }
  0x6b   : > { %v739_v35 = vmul.f32 %v1065_v33, %v735_v61 }
  0x6d   : > { %v744_v36 = vsub.f32 %v739_v35, %v743_v34 }
  0x6f   : > { %v765_v37 = vsel %vm1259_vm4, %v744_v36, 0.0 }
  0x70   : > { %v766_v39 = vsel %vm747_vm5, %v765_v37, 0.0 }
  0x71   : > { %v767_v62 = vrot.slane %v766_v39, 4 }
  0x73   : > { %v768_v43 = vadd.f32 %v767_v62, %v766_v39 }
  0x75   : > { %v769_v29 = vrot.slane %v768_v43, 2 }
  0x77   : > { %v770_v32 = vadd.f32 %v769_v29, %v768_v43 }
  0x79   : > { %v771_v45 = vrot.slane %v770_v32, 1 }
  0x7b   : > { %v772_v47 = vadd.f32 %v771_v45, %v770_v32 }
  0x7d   : > { %v790_v7 = vadd.f32 %v789_v46, %v772_v47 }
  0x7f   : > { %791 = vst [vmem:[%s1186_s18 + $0x2] sm:$0x1] %v790_v7 }
  0x80 PF: > { %s25_s12 = sadd.s32 1, %s1102_s12   ;;  %s1443_s10 = smov %s1098_s11 }
  0x81   : > { %p22_p11 = scmp.ge.s32.totalorder %s25_s12, 4   ;;  %s1444_s11 = smov %s1446_s0 }
  0x83   :  { %24 = sbr.rel (!%p22_p11) target bundleno = 17 (0x11), region = 114 }

</bundles_post_ra>
